<compile_context>
chip_gen: v6e
topology: v6e:2x2x1
jax: 0.10.0
libtpu: 0.0.40
codegen_flags: <defaults>
</compile_context>

<pallas_src>
import functools
import math

import jax
import jax.numpy as jnp
from jax.experimental import pallas as pl
from jax.experimental.pallas import tpu as pltpu


# clamp(1.2*sigmoid(y) - 0.1, 0, 1) > 0.49999  <=>  y > logit((0.49999 + 0.1) / 1.2)
_STEP_P = (0.49999 + 0.1) / 1.2
_STEP_LOGIT_THRESHOLD = math.log(_STEP_P / (1.0 - _STEP_P))
_BN_EPS = 1e-5


def _round_up(x, m):
    return -(-x // m) * m


# ----------------------------------------------------------------------------- kernel ---
def tg_kernel(prompt_ref,
              tw1, tb1, tw2, tb2, tw3, tb3, tw4, tb4,
              ew1, eb1, ew2, mask_ref,
              o_ref, *, thresh):
    # TaskLinear: 4x (Linear(no bias), BN scale folded into bf16 W -> +shift (f32) -> ReLU)
    h = prompt_ref[...].astype(jnp.bfloat16)
    for w, b in ((tw1, tb1), (tw2, tb2), (tw3, tb3), (tw4, tb4)):
        a = jnp.dot(h, w[...], preferred_element_type=jnp.float32) + b[...]
        h = jnp.maximum(a, 0.0).astype(jnp.bfloat16)

    # Fused expert stage: two block-diagonal bf16 matmuls cover every gate index and both the
    # expert-0 (selection) and expert-(E-1) (bias) paths at once.  Output stays f32.
    y = jnp.maximum(
        jnp.dot(h, ew1[...], preferred_element_type=jnp.float32) + eb1[...], 0.0
    ).astype(jnp.bfloat16)
    out = jnp.dot(y, ew2[...], preferred_element_type=jnp.float32)   # (TB, out_lanes_pad) f32

    # Selection lanes -> hard step (f32 compare); bias lanes pass through.  The 0/1 lane mask
    # is a tiny resident input (hoisted out of the per-step epilogue).
    step = (out > thresh).astype(jnp.float32)
    m = mask_ref[...]
    o_ref[...] = m * step + (1.0 - m) * out


# ------------------------------------------------------------------------ param helpers ---
def _fold_bn(gamma, beta, mean, var, eps=_BN_EPS):
    scale = gamma / jnp.sqrt(var + eps)
    shift = beta - mean * scale
    return scale.astype(jnp.float32), shift.astype(jnp.float32)


def make_params(key, d_model, gate_len, sel_len, kernel_number, expert_num):
    """Raw parameters mirroring the PyTorch module (eval-mode BN running stats)."""
    dims = [d_model, gate_len * 8, gate_len * 64, gate_len * 128, gate_len * sel_len]
    task = []
    for i in range(4):
        key, k1, k2, k3, k4, k5 = jax.random.split(key, 6)
        w = jax.random.normal(k1, (dims[i], dims[i + 1]), jnp.float32) / jnp.sqrt(dims[i])
        gamma = jax.random.uniform(k2, (dims[i + 1],), minval=0.5, maxval=1.5)
        beta = jax.random.normal(k3, (dims[i + 1],)) * 0.1
        mean = jax.random.normal(k4, (dims[i + 1],)) * 0.1
        var = jax.random.uniform(k5, (dims[i + 1],), minval=0.5, maxval=1.5)
        task.append((w, gamma, beta, mean, var))

    experts = []
    for _ in range(expert_num):
        key, k1, k2 = jax.random.split(key, 3)
        w1 = jax.random.normal(k1, (sel_len, 4 * sel_len), jnp.float32) / jnp.sqrt(sel_len)
        w2 = jax.random.normal(k2, (4 * sel_len, kernel_number), jnp.float32) / jnp.sqrt(4 * sel_len)
        bns = []
        for _ in range(gate_len):
            key, k3, k4, k5, k6 = jax.random.split(key, 5)
            gamma = jax.random.uniform(k3, (4 * sel_len,), minval=0.5, maxval=1.5)
            beta = jax.random.normal(k4, (4 * sel_len,)) * 0.1
            mean = jax.random.normal(k5, (4 * sel_len,)) * 0.1
            var = jax.random.uniform(k6, (4 * sel_len,), minval=0.5, maxval=1.5)
            bns.append((gamma, beta, mean, var))
        experts.append((w1, w2, bns))
    return task, experts


def pack_params(task, experts, *, gate_len, sel_len, kernel_number,
                weight_dtype=jnp.bfloat16):
    """One-time wrapper-side transform: fold BN scales into weights (stored bf16 for MXU),
    build block-diagonal fused expert weights (only experts 0 and expert_num-1 matter for the
    eval forward), pad the output lanes to a multiple of 128, and build the lane mask."""
    G, S, K = gate_len, sel_len, kernel_number
    out_lanes = 2 * G * K
    out_lanes_pad = _round_up(out_lanes, 128)   # keep the output store lane-dense/unmasked

    task_packed = []
    for (w, gamma, beta, mean, var) in task:
        scale, shift = _fold_bn(gamma, beta, mean, var)
        task_packed.append(((w * scale[None, :]).astype(weight_dtype),
                            shift[None, :].astype(jnp.float32)))

    e0_w1, e0_w2, e0_bns = experts[0]
    eL_w1, eL_w2, eL_bns = experts[-1]

    w1_big = jnp.zeros((G * S, G * 8 * S), jnp.float32)
    b1_big = jnp.zeros((1, G * 8 * S), jnp.float32)
    w2_big = jnp.zeros((G * 8 * S, out_lanes_pad), jnp.float32)
    for g in range(G):
        s0, h0 = _fold_bn(*e0_bns[g])
        sL, hL = _fold_bn(*eL_bns[g])
        blk = jnp.concatenate([e0_w1 * s0[None, :], eL_w1 * sL[None, :]], axis=1)  # (S, 8S)
        w1_big = w1_big.at[g * S:(g + 1) * S, g * 8 * S:(g + 1) * 8 * S].set(blk)
        b1_big = b1_big.at[0, g * 8 * S:(g + 1) * 8 * S].set(jnp.concatenate([h0, hL]))
        # expert-0 rows of gate g feed the selection lanes [g*K, (g+1)*K)
        w2_big = w2_big.at[g * 8 * S:g * 8 * S + 4 * S, g * K:(g + 1) * K].set(e0_w2)
        # expert-L rows of gate g feed the bias lanes [G*K + g*K, G*K + (g+1)*K)
        w2_big = w2_big.at[g * 8 * S + 4 * S:(g + 1) * 8 * S,
                           G * K + g * K:G * K + (g + 1) * K].set(eL_w2)

    gate_mask = (jnp.arange(out_lanes_pad) < G * K).astype(jnp.float32)[None, :]
    expert_packed = (w1_big.astype(weight_dtype), b1_big,
                     w2_big.astype(weight_dtype), gate_mask)
    return task_packed, expert_packed


# ---------------------------------------------------------------------------- wrapper ---
def _choose_batch_tile(B, cap=2048):
    """Batch tile: multiple of 8 (16 when large, bf16-friendly), at least 2 grid steps for
    non-trivial batches (so v7x's two TensorCores both get work via dimension_semantics),
    capped so per-step activations stay well inside every generation's VMEM."""
    if B <= 16:
        return _round_up(max(B, 1), 8)
    return min(cap, _round_up(-(-B // 2), 16))


def _vmem_limit_bytes(TB, d_model, G, S, out_lanes_pad, weight_bytes):
    # Generous estimate: all intermediates counted as f32, x3 for pipelining/relayout slack.
    act_cols = d_model + G * 8 + G * 64 + G * 128 + G * S + 8 * G * S + out_lanes_pad
    act_bytes = TB * act_cols * 4
    limit = 2 * weight_bytes + 3 * act_bytes + (8 << 20)
    # Floor above every generation's default scoped limit, cap safely below v7x's 64 MiB.
    return int(min(max(limit, 32 << 20), 48 << 20))


def tg_forward(prompt, task_packed, expert_packed, *, gate_len, sel_len, kernel_number,
               batch_tile=None):
    B, d_model = prompt.shape
    G, S, K = gate_len, sel_len, kernel_number
    out_lanes = 2 * G * K
    ew1, eb1, ew2, gate_mask = expert_packed
    out_lanes_pad = ew2.shape[1]

    TB = _choose_batch_tile(B) if batch_tile is None else batch_tile
    B_pad = _round_up(B, TB)            # pad instead of asserting divisibility
    if B_pad != B:
        prompt = jnp.pad(prompt, ((0, B_pad - B), (0, 0)))
    grid = (B_pad // TB,)

    flat_inputs = [prompt]
    for w, sh in task_packed:
        flat_inputs += [w, sh]
    flat_inputs += [ew1, eb1, ew2, gate_mask]

    weight_bytes = sum(int(a.size) * a.dtype.itemsize for a in flat_inputs[1:])
    vmem_limit = _vmem_limit_bytes(TB, d_model, G, S, out_lanes_pad, weight_bytes)

    kernel = functools.partial(tg_kernel, thresh=_STEP_LOGIT_THRESHOLD)

    def run(single_buffer_weights):
        in_specs = [pl.BlockSpec((TB, d_model), lambda b: (b, 0))]
        for arr in flat_inputs[1:]:
            # Weights/shifts/mask stay VMEM-resident (same block index every step).
            if single_buffer_weights:
                in_specs.append(pl.BlockSpec(arr.shape, lambda b: (0, 0),
                                             pipeline_mode=pl.Buffered(1)))
            else:
                in_specs.append(pl.BlockSpec(arr.shape, lambda b: (0, 0)))
        return pl.pallas_call(
            kernel,
            out_shape=jax.ShapeDtypeStruct((B_pad, out_lanes_pad), jnp.float32),
            grid_spec=pltpu.PrefetchScalarGridSpec(
                num_scalar_prefetch=0,
                grid=grid,
                in_specs=in_specs,
                out_specs=pl.BlockSpec((TB, out_lanes_pad), lambda b: (b, 0)),
            ),
            compiler_params=pltpu.CompilerParams(
                dimension_semantics=("parallel",),
                vmem_limit_bytes=vmem_limit),
        )(*flat_inputs)

    try:
        slab = run(True)          # single-buffer the constant-index weights (VMEM headroom)
    except Exception:
        slab = run(False)         # this jax build rejects Buffered(1): default double-buffer

    layer_selection = slab[:B, :G * K].reshape(B, G, K)
    layer_bias = slab[:B, G * K:out_lanes].reshape(B, G, K)
    return layer_selection, layer_bias


# -------------------------------------------------------------------------- references ---
def tg_reference(prompt, task, experts, *, gate_len, sel_len):
    """Pure-JAX f32 mirror of the PyTorch eval-mode forward, using the RAW parameters."""
    h = prompt.astype(jnp.float32)
    for (w, gamma, beta, mean, var) in task:
        h = h @ w
        h = (h - mean) / jnp.sqrt(var + _BN_EPS) * gamma + beta
        h = jnp.maximum(h, 0.0)
    B = h.shape[0]
    h = h.reshape(B, gate_len, sel_len)

    stacked = []
    for (w1, w2, bns) in (experts[0], experts[-1]):
        outs = []
        for g in range(gate_len):
            gamma, beta, mean, var = bns[g]
            x = h[:, g, :] @ w1
            x = (x - mean) / jnp.sqrt(var + _BN_EPS) * gamma + beta
            x = jnp.maximum(x, 0.0)
            outs.append(x @ w2)
        stacked.append(jnp.stack(outs, axis=1))

    sel = jax.nn.sigmoid(stacked[0])
    sel = jnp.clip(1.2 * sel - 0.1, 0.0, 1.0)
    sel = (sel > 0.49999).astype(jnp.float32)
    return sel, stacked[1]


def tg_reference_packed(prompt, task_packed, expert_packed, *, gate_len, kernel_number):
    """Pure-JAX mirror of exactly what the kernel computes (same bf16 weights, same bf16
    activation casts, f32 accumulation).  Returns (sel, bias, selection logits)."""
    G, K = gate_len, kernel_number
    ew1, eb1, ew2, gate_mask = expert_packed
    h = prompt.astype(jnp.bfloat16)
    for w, b in task_packed:
        a = jnp.dot(h, w, preferred_element_type=jnp.float32) + b
        h = jnp.maximum(a, 0.0).astype(jnp.bfloat16)
    y = jnp.maximum(
        jnp.dot(h, ew1, preferred_element_type=jnp.float32) + eb1, 0.0).astype(jnp.bfloat16)
    out = jnp.dot(y, ew2, preferred_element_type=jnp.float32)
    step = (out > _STEP_LOGIT_THRESHOLD).astype(jnp.float32)
    slab = gate_mask * step + (1.0 - gate_mask) * out
    B = prompt.shape[0]
    sel = slab[:, :G * K].reshape(B, G, K)
    bias = slab[:, G * K:2 * G * K].reshape(B, G, K)
    logits = out[:, :G * K].reshape(B, G, K)
    return sel, bias, logits


# -------------------------------------------------------------------------------- main ---
if __name__ == "__main__":
    B, d_model = 4, 32
    gate_len, sel_len, kernel_number, expert_num = 4, 8, 16, 3

    key = jax.random.PRNGKey(0)
    key, kp, kw = jax.random.split(key, 3)
    prompt = jax.random.normal(kp, (B, d_model), jnp.float32)
    task, experts = make_params(kw, d_model, gate_len, sel_len, kernel_number, expert_num)
    task_packed, expert_packed = pack_params(
        task, experts, gate_len=gate_len, sel_len=sel_len, kernel_number=kernel_number)

    sel, bias = tg_forward(prompt, task_packed, expert_packed,
                           gate_len=gate_len, sel_len=sel_len, kernel_number=kernel_number)
    jax.block_until_ready((sel, bias))

    assert sel.shape == (B, gate_len, kernel_number)
    assert bias.shape == (B, gate_len, kernel_number)

    # 1) Bit-faithful check against a pure-JAX mirror of the packed bf16 pipeline
    #    (differences can only come from MXU vs XLA accumulation order).
    sel_p, bias_p, logits_p = tg_reference_packed(
        prompt, task_packed, expert_packed, gate_len=gate_len, kernel_number=kernel_number)
    assert jnp.allclose(bias, bias_p, atol=2e-3, rtol=2e-3), "layer_bias mismatch (packed ref)"
    near_thresh = jnp.abs(logits_p - _STEP_LOGIT_THRESHOLD) < 1e-3
    assert bool(jnp.all((sel == sel_p) | near_thresh)), "layer_selection mismatch (packed ref)"

    # 2) End-to-end fidelity vs the raw f32 eval-mode reference (bf16 matmul tolerance;
    #    the discrete gate can only differ on logits that sit within bf16 noise of the
    #    threshold, so we check a high agreement fraction rather than exact equality).
    sel_ref, bias_ref = tg_reference(prompt, task, experts,
                                     gate_len=gate_len, sel_len=sel_len)
    assert jnp.allclose(bias, bias_ref, atol=1e-1, rtol=5e-2), "layer_bias drift vs f32 ref"
    agree = float(jnp.mean((sel == sel_ref).astype(jnp.float32)))
    assert agree >= 0.9, f"discrete-gate agreement with f32 reference too low: {agree:.3f}"

    print("KERNEL_OK")
</pallas_src>

<mosaic_0001>
module attributes {stable_mosaic.version = 11 : i64} {
  func.func @tg_kernel(%arg0: i32, %arg1: memref<8x32xf32, #tpu.memory_space<vmem>>, %arg2: memref<32x32xbf16, #tpu.memory_space<vmem>>, %arg3: memref<1x32xf32, #tpu.memory_space<vmem>>, %arg4: memref<32x256xbf16, #tpu.memory_space<vmem>>, %arg5: memref<1x256xf32, #tpu.memory_space<vmem>>, %arg6: memref<256x512xbf16, #tpu.memory_space<vmem>>, %arg7: memref<1x512xf32, #tpu.memory_space<vmem>>, %arg8: memref<512x32xbf16, #tpu.memory_space<vmem>>, %arg9: memref<1x32xf32, #tpu.memory_space<vmem>>, %arg10: memref<32x256xbf16, #tpu.memory_space<vmem>>, %arg11: memref<1x256xf32, #tpu.memory_space<vmem>>, %arg12: memref<256x128xbf16, #tpu.memory_space<vmem>>, %arg13: memref<1x128xf32, #tpu.memory_space<vmem>>, %arg14: memref<8x128xf32, #tpu.memory_space<vmem>>) attributes {dimension_semantics = [#tpu.dimension_semantics<parallel>], iteration_bounds = array<i64: 1>, scalar_prefetch = 0 : i64, scratch_operands = 0 : i64, tpu.core_type = #tpu.core_type<tc>, window_params = [{transform_indices = @transform_0, window_bounds = array<i64: 8, 32>}, {pipeline_mode = #tpu.pipeline_mode<synchronous>, transform_indices = @transform_1, window_bounds = array<i64: 32, 32>}, {pipeline_mode = #tpu.pipeline_mode<synchronous>, transform_indices = @transform_2, window_bounds = array<i64: 1, 32>}, {pipeline_mode = #tpu.pipeline_mode<synchronous>, transform_indices = @transform_3, window_bounds = array<i64: 32, 256>}, {pipeline_mode = #tpu.pipeline_mode<synchronous>, transform_indices = @transform_4, window_bounds = array<i64: 1, 256>}, {pipeline_mode = #tpu.pipeline_mode<synchronous>, transform_indices = @transform_5, window_bounds = array<i64: 256, 512>}, {pipeline_mode = #tpu.pipeline_mode<synchronous>, transform_indices = @transform_6, window_bounds = array<i64: 1, 512>}, {pipeline_mode = #tpu.pipeline_mode<synchronous>, transform_indices = @transform_7, window_bounds = array<i64: 512, 32>}, {pipeline_mode = #tpu.pipeline_mode<synchronous>, transform_indices = @transform_8, window_bounds = array<i64: 1, 32>}, {pipeline_mode = #tpu.pipeline_mode<synchronous>, transform_indices = @transform_9, window_bounds = array<i64: 32, 256>}, {pipeline_mode = #tpu.pipeline_mode<synchronous>, transform_indices = @transform_10, window_bounds = array<i64: 1, 256>}, {pipeline_mode = #tpu.pipeline_mode<synchronous>, transform_indices = @transform_11, window_bounds = array<i64: 256, 128>}, {pipeline_mode = #tpu.pipeline_mode<synchronous>, transform_indices = @transform_12, window_bounds = array<i64: 1, 128>}, {transform_indices = @transform_13, window_bounds = array<i64: 8, 128>}]} {
    %c0 = arith.constant 0 : index
    %c0_0 = arith.constant 0 : index
    %0 = vector.load %arg1[%c0, %c0_0] : memref<8x32xf32, #tpu.memory_space<vmem>>, vector<8x32xf32>
    %1 = arith.truncf %0 : vector<8x32xf32> to vector<8x32xbf16>
    %c0_1 = arith.constant 0 : index
    %c0_2 = arith.constant 0 : index
    %2 = vector.load %arg2[%c0_1, %c0_2] : memref<32x32xbf16, #tpu.memory_space<vmem>>, vector<32x32xbf16>
    %cst = arith.constant dense<0.000000e+00> : vector<8x32xf32>
    %3 = tpu.matmul %1, %2, %cst {dimension_numbers = #tpu.dot_dimension_numbers<[1], [0], [0], [1], [0, 0, 1, 1], [], []>} : vector<8x32xbf16>, vector<32x32xbf16>, vector<8x32xf32> -> vector<8x32xf32>
    %c0_3 = arith.constant 0 : index
    %c0_4 = arith.constant 0 : index
    %4 = vector.load %arg3[%c0_3, %c0_4] : memref<1x32xf32, #tpu.memory_space<vmem>>, vector<1x32xf32>
    %5 = vector.broadcast %4 : vector<1x32xf32> to vector<8x32xf32>
    %6 = arith.addf %3, %5 : vector<8x32xf32>
    %cst_5 = arith.constant 0.000000e+00 : f32
    %7 = vector.broadcast %cst_5 : f32 to vector<8x32xf32>
    %8 = arith.maximumf %6, %7 : vector<8x32xf32>
    %9 = arith.truncf %8 : vector<8x32xf32> to vector<8x32xbf16>
    %c0_6 = arith.constant 0 : index
    %c0_7 = arith.constant 0 : index
    %10 = vector.load %arg4[%c0_6, %c0_7] : memref<32x256xbf16, #tpu.memory_space<vmem>>, vector<32x256xbf16>
    %cst_8 = arith.constant dense<0.000000e+00> : vector<8x256xf32>
    %11 = tpu.matmul %9, %10, %cst_8 {dimension_numbers = #tpu.dot_dimension_numbers<[1], [0], [0], [1], [0, 0, 1, 1], [], []>} : vector<8x32xbf16>, vector<32x256xbf16>, vector<8x256xf32> -> vector<8x256xf32>
    %c0_9 = arith.constant 0 : index
    %c0_10 = arith.constant 0 : index
    %12 = vector.load %arg5[%c0_9, %c0_10] : memref<1x256xf32, #tpu.memory_space<vmem>>, vector<1x256xf32>
    %13 = vector.broadcast %12 : vector<1x256xf32> to vector<8x256xf32>
    %14 = arith.addf %11, %13 : vector<8x256xf32>
    %cst_11 = arith.constant 0.000000e+00 : f32
    %15 = vector.broadcast %cst_11 : f32 to vector<8x256xf32>
    %16 = arith.maximumf %14, %15 : vector<8x256xf32>
    %17 = arith.truncf %16 : vector<8x256xf32> to vector<8x256xbf16>
    %c0_12 = arith.constant 0 : index
    %c0_13 = arith.constant 0 : index
    %18 = vector.load %arg6[%c0_12, %c0_13] : memref<256x512xbf16, #tpu.memory_space<vmem>>, vector<256x512xbf16>
    %cst_14 = arith.constant dense<0.000000e+00> : vector<8x512xf32>
    %19 = tpu.matmul %17, %18, %cst_14 {dimension_numbers = #tpu.dot_dimension_numbers<[1], [0], [0], [1], [0, 0, 1, 1], [], []>} : vector<8x256xbf16>, vector<256x512xbf16>, vector<8x512xf32> -> vector<8x512xf32>
    %c0_15 = arith.constant 0 : index
    %c0_16 = arith.constant 0 : index
    %20 = vector.load %arg7[%c0_15, %c0_16] : memref<1x512xf32, #tpu.memory_space<vmem>>, vector<1x512xf32>
    %21 = vector.broadcast %20 : vector<1x512xf32> to vector<8x512xf32>
    %22 = arith.addf %19, %21 : vector<8x512xf32>
    %cst_17 = arith.constant 0.000000e+00 : f32
    %23 = vector.broadcast %cst_17 : f32 to vector<8x512xf32>
    %24 = arith.maximumf %22, %23 : vector<8x512xf32>
    %25 = arith.truncf %24 : vector<8x512xf32> to vector<8x512xbf16>
    %c0_18 = arith.constant 0 : index
    %c0_19 = arith.constant 0 : index
    %26 = vector.load %arg8[%c0_18, %c0_19] : memref<512x32xbf16, #tpu.memory_space<vmem>>, vector<512x32xbf16>
    %cst_20 = arith.constant dense<0.000000e+00> : vector<8x32xf32>
    %27 = tpu.matmul %25, %26, %cst_20 {dimension_numbers = #tpu.dot_dimension_numbers<[1], [0], [0], [1], [0, 0, 1, 1], [], []>} : vector<8x512xbf16>, vector<512x32xbf16>, vector<8x32xf32> -> vector<8x32xf32>
    %c0_21 = arith.constant 0 : index
    %c0_22 = arith.constant 0 : index
    %28 = vector.load %arg9[%c0_21, %c0_22] : memref<1x32xf32, #tpu.memory_space<vmem>>, vector<1x32xf32>
    %29 = vector.broadcast %28 : vector<1x32xf32> to vector<8x32xf32>
    %30 = arith.addf %27, %29 : vector<8x32xf32>
    %cst_23 = arith.constant 0.000000e+00 : f32
    %31 = vector.broadcast %cst_23 : f32 to vector<8x32xf32>
    %32 = arith.maximumf %30, %31 : vector<8x32xf32>
    %33 = arith.truncf %32 : vector<8x32xf32> to vector<8x32xbf16>
    %c0_24 = arith.constant 0 : index
    %c0_25 = arith.constant 0 : index
    %34 = vector.load %arg10[%c0_24, %c0_25] : memref<32x256xbf16, #tpu.memory_space<vmem>>, vector<32x256xbf16>
    %cst_26 = arith.constant dense<0.000000e+00> : vector<8x256xf32>
    %35 = tpu.matmul %33, %34, %cst_26 {dimension_numbers = #tpu.dot_dimension_numbers<[1], [0], [0], [1], [0, 0, 1, 1], [], []>} : vector<8x32xbf16>, vector<32x256xbf16>, vector<8x256xf32> -> vector<8x256xf32>
    %c0_27 = arith.constant 0 : index
    %c0_28 = arith.constant 0 : index
    %36 = vector.load %arg11[%c0_27, %c0_28] : memref<1x256xf32, #tpu.memory_space<vmem>>, vector<1x256xf32>
    %37 = vector.broadcast %36 : vector<1x256xf32> to vector<8x256xf32>
    %38 = arith.addf %35, %37 : vector<8x256xf32>
    %cst_29 = arith.constant 0.000000e+00 : f32
    %39 = vector.broadcast %cst_29 : f32 to vector<8x256xf32>
    %40 = arith.maximumf %38, %39 : vector<8x256xf32>
    %41 = arith.truncf %40 : vector<8x256xf32> to vector<8x256xbf16>
    %c0_30 = arith.constant 0 : index
    %c0_31 = arith.constant 0 : index
    %42 = vector.load %arg12[%c0_30, %c0_31] : memref<256x128xbf16, #tpu.memory_space<vmem>>, vector<256x128xbf16>
    %cst_32 = arith.constant dense<0.000000e+00> : vector<8x128xf32>
    %43 = tpu.matmul %41, %42, %cst_32 {dimension_numbers = #tpu.dot_dimension_numbers<[1], [0], [0], [1], [0, 0, 1, 1], [], []>} : vector<8x256xbf16>, vector<256x128xbf16>, vector<8x128xf32> -> vector<8x128xf32>
    %cst_33 = arith.constant -3.33333337E-5 : f32
    %44 = vector.broadcast %cst_33 : f32 to vector<8x128xf32>
    %45 = arith.cmpf ogt, %43, %44 : vector<8x128xf32>
    %46 = arith.extui %45 : vector<8x128xi1> to vector<8x128xi32>
    %47 = arith.sitofp %46 : vector<8x128xi32> to vector<8x128xf32>
    %c0_34 = arith.constant 0 : index
    %c0_35 = arith.constant 0 : index
    %48 = vector.load %arg13[%c0_34, %c0_35] : memref<1x128xf32, #tpu.memory_space<vmem>>, vector<1x128xf32>
    %49 = vector.broadcast %48 : vector<1x128xf32> to vector<8x128xf32>
    %50 = arith.mulf %49, %47 : vector<8x128xf32>
    %cst_36 = arith.constant 1.000000e+00 : f32
    %51 = vector.broadcast %cst_36 : f32 to vector<1x128xf32>
    %52 = arith.subf %51, %48 : vector<1x128xf32>
    %53 = vector.broadcast %52 : vector<1x128xf32> to vector<8x128xf32>
    %54 = arith.mulf %53, %43 : vector<8x128xf32>
    %55 = arith.addf %50, %54 : vector<8x128xf32>
    %c0_37 = arith.constant 0 : index
    %c0_38 = arith.constant 0 : index
    %56 = vector.load %arg14[%c0_37, %c0_38] : memref<8x128xf32, #tpu.memory_space<vmem>>, vector<8x128xf32>
    tpu.vector_store %arg14[%c0_37, %c0_38], %55 {strides = array<i32>} : memref<8x128xf32, #tpu.memory_space<vmem>>, vector<8x128xf32>,
    return
  }
  func.func @transform_0(%arg0: i32) -> (i32, i32) {
    %c0_i32 = arith.constant 0 : i32
    %c0_i32_0 = arith.constant 0 : i32
    return %arg0, %c0_i32 : i32, i32
  }
  func.func @transform_1(%arg0: i32) -> (i32, i32) {
    %c0_i32 = arith.constant 0 : i32
    %c0_i32_0 = arith.constant 0 : i32
    %c0_i32_1 = arith.constant 0 : i32
    return %c0_i32, %c0_i32_0 : i32, i32
  }
  func.func @transform_2(%arg0: i32) -> (i32, i32) {
    %c0_i32 = arith.constant 0 : i32
    %c0_i32_0 = arith.constant 0 : i32
    %c0_i32_1 = arith.constant 0 : i32
    return %c0_i32, %c0_i32_0 : i32, i32
  }
  func.func @transform_3(%arg0: i32) -> (i32, i32) {
    %c0_i32 = arith.constant 0 : i32
    %c0_i32_0 = arith.constant 0 : i32
    %c0_i32_1 = arith.constant 0 : i32
    return %c0_i32, %c0_i32_0 : i32, i32
  }
  func.func @transform_4(%arg0: i32) -> (i32, i32) {
    %c0_i32 = arith.constant 0 : i32
    %c0_i32_0 = arith.constant 0 : i32
    %c0_i32_1 = arith.constant 0 : i32
    return %c0_i32, %c0_i32_0 : i32, i32
  }
  func.func @transform_5(%arg0: i32) -> (i32, i32) {
    %c0_i32 = arith.constant 0 : i32
    %c0_i32_0 = arith.constant 0 : i32
    %c0_i32_1 = arith.constant 0 : i32
    return %c0_i32, %c0_i32_0 : i32, i32
  }
  func.func @transform_6(%arg0: i32) -> (i32, i32) {
    %c0_i32 = arith.constant 0 : i32
    %c0_i32_0 = arith.constant 0 : i32
    %c0_i32_1 = arith.constant 0 : i32
    return %c0_i32, %c0_i32_0 : i32, i32
  }
  func.func @transform_7(%arg0: i32) -> (i32, i32) {
    %c0_i32 = arith.constant 0 : i32
    %c0_i32_0 = arith.constant 0 : i32
    %c0_i32_1 = arith.constant 0 : i32
    return %c0_i32, %c0_i32_0 : i32, i32
  }
  func.func @transform_8(%arg0: i32) -> (i32, i32) {
    %c0_i32 = arith.constant 0 : i32
    %c0_i32_0 = arith.constant 0 : i32
    %c0_i32_1 = arith.constant 0 : i32
    return %c0_i32, %c0_i32_0 : i32, i32
  }
  func.func @transform_9(%arg0: i32) -> (i32, i32) {
    %c0_i32 = arith.constant 0 : i32
    %c0_i32_0 = arith.constant 0 : i32
    %c0_i32_1 = arith.constant 0 : i32
    return %c0_i32, %c0_i32_0 : i32, i32
  }
  func.func @transform_10(%arg0: i32) -> (i32, i32) {
    %c0_i32 = arith.constant 0 : i32
    %c0_i32_0 = arith.constant 0 : i32
    %c0_i32_1 = arith.constant 0 : i32
    return %c0_i32, %c0_i32_0 : i32, i32
  }
  func.func @transform_11(%arg0: i32) -> (i32, i32) {
    %c0_i32 = arith.constant 0 : i32
    %c0_i32_0 = arith.constant 0 : i32
    %c0_i32_1 = arith.constant 0 : i32
    return %c0_i32, %c0_i32_0 : i32, i32
  }
  func.func @transform_12(%arg0: i32) -> (i32, i32) {
    %c0_i32 = arith.constant 0 : i32
    %c0_i32_0 = arith.constant 0 : i32
    %c0_i32_1 = arith.constant 0 : i32
    return %c0_i32, %c0_i32_0 : i32, i32
  }
  func.func @transform_13(%arg0: i32) -> (i32, i32) {
    %c0_i32 = arith.constant 0 : i32
    %c0_i32_0 = arith.constant 0 : i32
    return %arg0, %c0_i32 : i32, i32
  }
}

module attributes {stable_mosaic.version = 11 : i64} {
  func.func @tg_kernel(%arg0: i32, %arg1: memref<8x32xf32, #tpu.memory_space<vmem>>, %arg2: memref<32x32xbf16, #tpu.memory_space<vmem>>, %arg3: memref<1x32xf32, #tpu.memory_space<vmem>>, %arg4: memref<32x256xbf16, #tpu.memory_space<vmem>>, %arg5: memref<1x256xf32, #tpu.memory_space<vmem>>, %arg6: memref<256x512xbf16, #tpu.memory_space<vmem>>, %arg7: memref<1x512xf32, #tpu.memory_space<vmem>>, %arg8: memref<512x32xbf16, #tpu.memory_space<vmem>>, %arg9: memref<1x32xf32, #tpu.memory_space<vmem>>, %arg10: memref<32x256xbf16, #tpu.memory_space<vmem>>, %arg11: memref<1x256xf32, #tpu.memory_space<vmem>>, %arg12: memref<256x128xbf16, #tpu.memory_space<vmem>>, %arg13: memref<1x128xf32, #tpu.memory_space<vmem>>, %arg14: memref<8x128xf32, #tpu.memory_space<vmem>>) attributes {dimension_semantics = [#tpu.dimension_semantics<parallel>], iteration_bounds = array<i64: 1>, scalar_prefetch = 0 : i64, scratch_operands = 0 : i64, tpu.core_type = #tpu.core_type<tc>, window_params = [{transform_indices = @transform_0, window_bounds = array<i64: 8, 32>}, {pipeline_mode = #tpu.pipeline_mode<synchronous>, transform_indices = @transform_1, window_bounds = array<i64: 32, 32>}, {pipeline_mode = #tpu.pipeline_mode<synchronous>, transform_indices = @transform_2, window_bounds = array<i64: 1, 32>}, {pipeline_mode = #tpu.pipeline_mode<synchronous>, transform_indices = @transform_3, window_bounds = array<i64: 32, 256>}, {pipeline_mode = #tpu.pipeline_mode<synchronous>, transform_indices = @transform_4, window_bounds = array<i64: 1, 256>}, {pipeline_mode = #tpu.pipeline_mode<synchronous>, transform_indices = @transform_5, window_bounds = array<i64: 256, 512>}, {pipeline_mode = #tpu.pipeline_mode<synchronous>, transform_indices = @transform_6, window_bounds = array<i64: 1, 512>}, {pipeline_mode = #tpu.pipeline_mode<synchronous>, transform_indices = @transform_7, window_bounds = array<i64: 512, 32>}, {pipeline_mode = #tpu.pipeline_mode<synchronous>, transform_indices = @transform_8, window_bounds = array<i64: 1, 32>}, {pipeline_mode = #tpu.pipeline_mode<synchronous>, transform_indices = @transform_9, window_bounds = array<i64: 32, 256>}, {pipeline_mode = #tpu.pipeline_mode<synchronous>, transform_indices = @transform_10, window_bounds = array<i64: 1, 256>}, {pipeline_mode = #tpu.pipeline_mode<synchronous>, transform_indices = @transform_11, window_bounds = array<i64: 256, 128>}, {pipeline_mode = #tpu.pipeline_mode<synchronous>, transform_indices = @transform_12, window_bounds = array<i64: 1, 128>}, {transform_indices = @transform_13, window_bounds = array<i64: 8, 128>}]} {
    %c0 = arith.constant 0 : index
    %c0_0 = arith.constant 0 : index
    %0 = vector.load %arg1[%c0, %c0_0] : memref<8x32xf32, #tpu.memory_space<vmem>>, vector<8x32xf32>
    %1 = arith.truncf %0 : vector<8x32xf32> to vector<8x32xbf16>
    %c0_1 = arith.constant 0 : index
    %c0_2 = arith.constant 0 : index
    %2 = vector.load %arg2[%c0_1, %c0_2] : memref<32x32xbf16, #tpu.memory_space<vmem>>, vector<32x32xbf16>
    %cst = arith.constant dense<0.000000e+00> : vector<8x32xf32>
    %3 = tpu.matmul %1, %2, %cst {dimension_numbers = #tpu.dot_dimension_numbers<[1], [0], [0], [1], [0, 0, 1, 1], [], []>} : vector<8x32xbf16>, vector<32x32xbf16>, vector<8x32xf32> -> vector<8x32xf32>
    %c0_3 = arith.constant 0 : index
    %c0_4 = arith.constant 0 : index
    %4 = vector.load %arg3[%c0_3, %c0_4] : memref<1x32xf32, #tpu.memory_space<vmem>>, vector<1x32xf32>
    %5 = vector.broadcast %4 : vector<1x32xf32> to vector<8x32xf32>
    %6 = arith.addf %3, %5 : vector<8x32xf32>
    %cst_5 = arith.constant 0.000000e+00 : f32
    %7 = vector.broadcast %cst_5 : f32 to vector<8x32xf32>
    %8 = arith.maximumf %6, %7 : vector<8x32xf32>
    %9 = arith.truncf %8 : vector<8x32xf32> to vector<8x32xbf16>
    %c0_6 = arith.constant 0 : index
    %c0_7 = arith.constant 0 : index
    %10 = vector.load %arg4[%c0_6, %c0_7] : memref<32x256xbf16, #tpu.memory_space<vmem>>, vector<32x256xbf16>
    %cst_8 = arith.constant dense<0.000000e+00> : vector<8x256xf32>
    %11 = tpu.matmul %9, %10, %cst_8 {dimension_numbers = #tpu.dot_dimension_numbers<[1], [0], [0], [1], [0, 0, 1, 1], [], []>} : vector<8x32xbf16>, vector<32x256xbf16>, vector<8x256xf32> -> vector<8x256xf32>
    %c0_9 = arith.constant 0 : index
    %c0_10 = arith.constant 0 : index
    %12 = vector.load %arg5[%c0_9, %c0_10] : memref<1x256xf32, #tpu.memory_space<vmem>>, vector<1x256xf32>
    %13 = vector.broadcast %12 : vector<1x256xf32> to vector<8x256xf32>
    %14 = arith.addf %11, %13 : vector<8x256xf32>
    %cst_11 = arith.constant 0.000000e+00 : f32
    %15 = vector.broadcast %cst_11 : f32 to vector<8x256xf32>
    %16 = arith.maximumf %14, %15 : vector<8x256xf32>
    %17 = arith.truncf %16 : vector<8x256xf32> to vector<8x256xbf16>
    %c0_12 = arith.constant 0 : index
    %c0_13 = arith.constant 0 : index
    %18 = vector.load %arg6[%c0_12, %c0_13] : memref<256x512xbf16, #tpu.memory_space<vmem>>, vector<256x512xbf16>
    %cst_14 = arith.constant dense<0.000000e+00> : vector<8x512xf32>
    %19 = tpu.matmul %17, %18, %cst_14 {dimension_numbers = #tpu.dot_dimension_numbers<[1], [0], [0], [1], [0, 0, 1, 1], [], []>} : vector<8x256xbf16>, vector<256x512xbf16>, vector<8x512xf32> -> vector<8x512xf32>
    %c0_15 = arith.constant 0 : index
    %c0_16 = arith.constant 0 : index
    %20 = vector.load %arg7[%c0_15, %c0_16] : memref<1x512xf32, #tpu.memory_space<vmem>>, vector<1x512xf32>
    %21 = vector.broadcast %20 : vector<1x512xf32> to vector<8x512xf32>
    %22 = arith.addf %19, %21 : vector<8x512xf32>
    %cst_17 = arith.constant 0.000000e+00 : f32
    %23 = vector.broadcast %cst_17 : f32 to vector<8x512xf32>
    %24 = arith.maximumf %22, %23 : vector<8x512xf32>
    %25 = arith.truncf %24 : vector<8x512xf32> to vector<8x512xbf16>
    %c0_18 = arith.constant 0 : index
    %c0_19 = arith.constant 0 : index
    %26 = vector.load %arg8[%c0_18, %c0_19] : memref<512x32xbf16, #tpu.memory_space<vmem>>, vector<512x32xbf16>
    %cst_20 = arith.constant dense<0.000000e+00> : vector<8x32xf32>
    %27 = tpu.matmul %25, %26, %cst_20 {dimension_numbers = #tpu.dot_dimension_numbers<[1], [0], [0], [1], [0, 0, 1, 1], [], []>} : vector<8x512xbf16>, vector<512x32xbf16>, vector<8x32xf32> -> vector<8x32xf32>
    %c0_21 = arith.constant 0 : index
    %c0_22 = arith.constant 0 : index
    %28 = vector.load %arg9[%c0_21, %c0_22] : memref<1x32xf32, #tpu.memory_space<vmem>>, vector<1x32xf32>
    %29 = vector.broadcast %28 : vector<1x32xf32> to vector<8x32xf32>
    %30 = arith.addf %27, %29 : vector<8x32xf32>
    %cst_23 = arith.constant 0.000000e+00 : f32
    %31 = vector.broadcast %cst_23 : f32 to vector<8x32xf32>
    %32 = arith.maximumf %30, %31 : vector<8x32xf32>
    %33 = arith.truncf %32 : vector<8x32xf32> to vector<8x32xbf16>
    %c0_24 = arith.constant 0 : index
    %c0_25 = arith.constant 0 : index
    %34 = vector.load %arg10[%c0_24, %c0_25] : memref<32x256xbf16, #tpu.memory_space<vmem>>, vector<32x256xbf16>
    %cst_26 = arith.constant dense<0.000000e+00> : vector<8x256xf32>
    %35 = tpu.matmul %33, %34, %cst_26 {dimension_numbers = #tpu.dot_dimension_numbers<[1], [0], [0], [1], [0, 0, 1, 1], [], []>} : vector<8x32xbf16>, vector<32x256xbf16>, vector<8x256xf32> -> vector<8x256xf32>
    %c0_27 = arith.constant 0 : index
    %c0_28 = arith.constant 0 : index
    %36 = vector.load %arg11[%c0_27, %c0_28] : memref<1x256xf32, #tpu.memory_space<vmem>>, vector<1x256xf32>
    %37 = vector.broadcast %36 : vector<1x256xf32> to vector<8x256xf32>
    %38 = arith.addf %35, %37 : vector<8x256xf32>
    %cst_29 = arith.constant 0.000000e+00 : f32
    %39 = vector.broadcast %cst_29 : f32 to vector<8x256xf32>
    %40 = arith.maximumf %38, %39 : vector<8x256xf32>
    %41 = arith.truncf %40 : vector<8x256xf32> to vector<8x256xbf16>
    %c0_30 = arith.constant 0 : index
    %c0_31 = arith.constant 0 : index
    %42 = vector.load %arg12[%c0_30, %c0_31] : memref<256x128xbf16, #tpu.memory_space<vmem>>, vector<256x128xbf16>
    %cst_32 = arith.constant dense<0.000000e+00> : vector<8x128xf32>
    %43 = tpu.matmul %41, %42, %cst_32 {dimension_numbers = #tpu.dot_dimension_numbers<[1], [0], [0], [1], [0, 0, 1, 1], [], []>} : vector<8x256xbf16>, vector<256x128xbf16>, vector<8x128xf32> -> vector<8x128xf32>
    %cst_33 = arith.constant -3.33333337E-5 : f32
    %44 = vector.broadcast %cst_33 : f32 to vector<8x128xf32>
    %45 = arith.cmpf ogt, %43, %44 : vector<8x128xf32>
    %46 = arith.extui %45 : vector<8x128xi1> to vector<8x128xi32>
    %47 = arith.sitofp %46 : vector<8x128xi32> to vector<8x128xf32>
    %c0_34 = arith.constant 0 : index
    %c0_35 = arith.constant 0 : index
    %48 = vector.load %arg13[%c0_34, %c0_35] : memref<1x128xf32, #tpu.memory_space<vmem>>, vector<1x128xf32>
    %49 = vector.broadcast %48 : vector<1x128xf32> to vector<8x128xf32>
    %50 = arith.mulf %49, %47 : vector<8x128xf32>
    %cst_36 = arith.constant 1.000000e+00 : f32
    %51 = vector.broadcast %cst_36 : f32 to vector<1x128xf32>
    %52 = arith.subf %51, %48 : vector<1x128xf32>
    %53 = vector.broadcast %52 : vector<1x128xf32> to vector<8x128xf32>
    %54 = arith.mulf %53, %43 : vector<8x128xf32>
    %55 = arith.addf %50, %54 : vector<8x128xf32>
    %c0_37 = arith.constant 0 : index
    %c0_38 = arith.constant 0 : index
    %56 = vector.load %arg14[%c0_37, %c0_38] : memref<8x128xf32, #tpu.memory_space<vmem>>, vector<8x128xf32>
    tpu.vector_store %arg14[%c0_37, %c0_38], %55 {strides = array<i32>} : memref<8x128xf32, #tpu.memory_space<vmem>>, vector<8x128xf32>,
    return
  }
  func.func @transform_0(%arg0: i32) -> (i32, i32) {
    %c0_i32 = arith.constant 0 : i32
    %c0_i32_0 = arith.constant 0 : i32
    return %arg0, %c0_i32 : i32, i32
  }
  func.func @transform_1(%arg0: i32) -> (i32, i32) {
    %c0_i32 = arith.constant 0 : i32
    %c0_i32_0 = arith.constant 0 : i32
    %c0_i32_1 = arith.constant 0 : i32
    return %c0_i32, %c0_i32_0 : i32, i32
  }
  func.func @transform_2(%arg0: i32) -> (i32, i32) {
    %c0_i32 = arith.constant 0 : i32
    %c0_i32_0 = arith.constant 0 : i32
    %c0_i32_1 = arith.constant 0 : i32
    return %c0_i32, %c0_i32_0 : i32, i32
  }
  func.func @transform_3(%arg0: i32) -> (i32, i32) {
    %c0_i32 = arith.constant 0 : i32
    %c0_i32_0 = arith.constant 0 : i32
    %c0_i32_1 = arith.constant 0 : i32
    return %c0_i32, %c0_i32_0 : i32, i32
  }
  func.func @transform_4(%arg0: i32) -> (i32, i32) {
    %c0_i32 = arith.constant 0 : i32
    %c0_i32_0 = arith.constant 0 : i32
    %c0_i32_1 = arith.constant 0 : i32
    return %c0_i32, %c0_i32_0 : i32, i32
  }
  func.func @transform_5(%arg0: i32) -> (i32, i32) {
    %c0_i32 = arith.constant 0 : i32
    %c0_i32_0 = arith.constant 0 : i32
    %c0_i32_1 = arith.constant 0 : i32
    return %c0_i32, %c0_i32_0 : i32, i32
  }
  func.func @transform_6(%arg0: i32) -> (i32, i32) {
    %c0_i32 = arith.constant 0 : i32
    %c0_i32_0 = arith.constant 0 : i32
    %c0_i32_1 = arith.constant 0 : i32
    return %c0_i32, %c0_i32_0 : i32, i32
  }
  func.func @transform_7(%arg0: i32) -> (i32, i32) {
    %c0_i32 = arith.constant 0 : i32
    %c0_i32_0 = arith.constant 0 : i32
    %c0_i32_1 = arith.constant 0 : i32
    return %c0_i32, %c0_i32_0 : i32, i32
  }
  func.func @transform_8(%arg0: i32) -> (i32, i32) {
    %c0_i32 = arith.constant 0 : i32
    %c0_i32_0 = arith.constant 0 : i32
    %c0_i32_1 = arith.constant 0 : i32
    return %c0_i32, %c0_i32_0 : i32, i32
  }
  func.func @transform_9(%arg0: i32) -> (i32, i32) {
    %c0_i32 = arith.constant 0 : i32
    %c0_i32_0 = arith.constant 0 : i32
    %c0_i32_1 = arith.constant 0 : i32
    return %c0_i32, %c0_i32_0 : i32, i32
  }
  func.func @transform_10(%arg0: i32) -> (i32, i32) {
    %c0_i32 = arith.constant 0 : i32
    %c0_i32_0 = arith.constant 0 : i32
    %c0_i32_1 = arith.constant 0 : i32
    return %c0_i32, %c0_i32_0 : i32, i32
  }
  func.func @transform_11(%arg0: i32) -> (i32, i32) {
    %c0_i32 = arith.constant 0 : i32
    %c0_i32_0 = arith.constant 0 : i32
    %c0_i32_1 = arith.constant 0 : i32
    return %c0_i32, %c0_i32_0 : i32, i32
  }
  func.func @transform_12(%arg0: i32) -> (i32, i32) {
    %c0_i32 = arith.constant 0 : i32
    %c0_i32_0 = arith.constant 0 : i32
    %c0_i32_1 = arith.constant 0 : i32
    return %c0_i32, %c0_i32_0 : i32, i32
  }
  func.func @transform_13(%arg0: i32) -> (i32, i32) {
    %c0_i32 = arith.constant 0 : i32
    %c0_i32_0 = arith.constant 0 : i32
    return %arg0, %c0_i32 : i32, i32
  }
}

</mosaic_0001>

<bundles_post_ra>
// kernel: tpu_custom_call.1
= control target key start
LH: loop header
LB: loop body
LE: loop exit
PB: predicated region body
PF: predicated region fallthrough
CT: control target
= control target key end

     0   :  { %18 = vsyncpa [#allocation3], 0  ;;  %s2063_s0 = inlined_call_operand.vmem [shape: f32[8,32], index: 0, kind: input, shape index: {}]   ;;  %s2064_s1 = inlined_call_operand.vmem [shape: bf16[32,32], index: 1, kind: input, shape index: {}]   ;;  %s2065_s2 = inlined_call_operand.vmem [shape: f32[1,32], index: 2, kind: input, shape index: {}]   ;;  %s2066_s3 = inlined_call_operand.vmem [shape: bf16[32,256], index: 3, kind: input, shape index: {}]   ;;  %s2067_s4 = inlined_call_operand.vmem [shape: f32[1,256], index: 4, kind: input, shape index: {}]   ;;  %s2068_s5 = inlined_call_operand.hbm [shape: bf16[256,512], index: 5, kind: input, shape index: {}]   ;;  %s2069_s6 = inlined_call_operand.vmem [shape: f32[1,512], index: 6, kind: input, shape index: {}]   ;;  %s2070_s7 = inlined_call_operand.vmem [shape: bf16[512,32], index: 7, kind: input, shape index: {}]   ;;  %s2071_s8 = inlined_call_operand.vmem [shape: f32[1,32], index: 8, kind: input, shape index: {}]   ;;  %s2072_s9 = inlined_call_operand.vmem [shape: bf16[32,256], index: 9, kind: input, shape index: {}]   ;;  %s2073_s10 = inlined_call_operand.vmem [shape: f32[1,256], index: 10, kind: input, shape index: {}]   ;;  %s2074_s11 = inlined_call_operand.vmem [shape: bf16[256,128], index: 11, kind: input, shape index: {}]   ;;  %s2075_s12 = inlined_call_operand.vmem [shape: f32[1,128], index: 12, kind: input, shape index: {}]   ;;  %s2076_s13 = inlined_call_operand.hbm [shape: f32[8,128], index: 13, kind: output, shape index: {}]  }
   0x1   :  { %19 = vsyncpa [#allocation4], 0  ;;  %s1758_s25 = smov [#allocation2]  }
   0x2   :  { %s35_s26 = sshll.u32 %s1758_s25, 4  ;;  %s36_s26 = int_to_ptr.vmem [resolvable:$true] %s35_s26 }
   0x3   :  { %s1722_s27 = scalar_lea.vmem %s36_s26, 8192  ;;  %p1727_p1 = scmp.lt.s32.totalorder %s36_s26, %s36_s26 }
   0x4   :  { %p1723_p0 = scmp.ne.s32.totalorder %s36_s26, %s1722_s27  ;;  %p1728_p2 = scmp.lt.s32.totalorder %s1722_s27, %s1722_s27 }
   0x6   :  { %p1729_p3 = por %p1728_p2, %p1727_p1 }
   0x8   :  { %p1730_p4 = pnand %p1729_p3, %p1723_p0 }
   0xa   :  { %1733 = shalt.err (!%p1730_p4)
}
   0xb   :  { %s1759_s28 = smov 256   ;;  %s1760_s29 = smov 16  }
   0xc   :  { %41 = dma.hbm_to_vmem [thread:$0]  %s2068_s5, 8192, %s36_s26, [#allocation3], %s1759_s28, %s1759_s28, %s1760_s29  }
   0xd   :  { %1754 = dma.done.wait [#allocation3], 8192  }
   0xe   :  { %1755 = vsyncadd [#allocation3], 4294959104  ;;  %v1761_v0 = vmov 0.0   ;;  %vm1762_vm0 = vmmov 0   ;;  %v1556_v1 = vld [vmem:[%s2064_s1 + $0x8] sm:$0xff]   ;;  %v1557_v2 = vld [vmem:[%s2064_s1] sm:$0xff]  }
   0xf   :  { %1541 = vmatprep.subr.bf16.mxu0 %v1761_v0  ;;  %1545 = vmatprep.mubr.msk.bf16.mxu0 %vm1762_vm0, %v1761_v0  ;;  %v60_v3 = vld [vmem:[%s2063_s0] sm:$0xff]  ;;  %v1560_v4 = vld [vmem:[%s2066_s3 + $0x14] ss:$8 sps:$4 sm:$0xff]   ;;  %v1558_v5 = vld [vmem:[%s2066_s3 + $0x10] ss:$8 sps:$4 sm:$0xff]   ;;  %vm85_vm1 = vcmask 261120  }
  0x10   :  { %1542 = vmatpush3.bf16.msra.mxu0 %v1556_v1  ;;  %v61_v6 = vpack.c.bf16 %v60_v3, %v60_v3  ;;  %v1563_v7 = vld [vmem:[%s2066_s3 + $0x4] ss:$8 sps:$4 sm:$0xff]   ;;  %v1561_v8 = vld [vmem:[%s2066_s3] ss:$8 sps:$4 sm:$0xff]   ;;  %v1763_v9 = vmov 0  }
  0x11   :  { %1543 = vmatprep.subr.bf16.mxu0 %v1761_v0  ;;  %v1566_v10 = vld [vmem:[#allocation2 + $0xe4] ss:$16 sps:$4 sm:$0xff]   ;;  %v1567_v11 = vld [vmem:[#allocation2 + $0xec] ss:$16 sps:$4 sm:$0xff]   ;;  %v1569_v12 = vld [vmem:[#allocation2 + $0xe8] ss:$16 sps:$4 sm:$0xff]  }
  0x12   :  { %662 = vmatprep.subr.bf16.mxu1 %v1567_v11  ;;  %v1573_v13 = vld [vmem:[#allocation2 + $0xcc] ss:$16 sps:$4 sm:$0xff]   ;;  %v1575_v14 = vld [vmem:[#allocation2 + $0xc8] ss:$16 sps:$4 sm:$0xff]   ;;  %v1344_v39 = vld [vmem:[%s2065_s2] ss:$0 sm:$0xff] }
  0x13   :  { %663 = vmatpush1.bf16.msra.mxu1 %v1569_v12  ;;  %v1579_v15 = vld [vmem:[#allocation2 + $0xac] ss:$16 sps:$4 sm:$0xff]   ;;  %v1581_v16 = vld [vmem:[#allocation2 + $0xa8] ss:$16 sps:$4 sm:$0xff]   ;;  %v1564_v45 = vld [vmem:[#allocation2 + $0xe0] ss:$16 sps:$4 sm:$0xff]  }
  0x14   :  { %1544 = vmatpush3.bf16.msra.mxu0 %v1557_v2  ;;  %664 = vmatprep.subr.bf16.mxu1 %v1573_v13  ;;  %v1585_v17 = vld [vmem:[#allocation2 + $0x8c] ss:$16 sps:$4 sm:$0xff]   ;;  %v1587_v18 = vld [vmem:[#allocation2 + $0x88] ss:$16 sps:$4 sm:$0xff]   ;;  %v1572_v47 = vld [vmem:[#allocation2 + $0xc4] ss:$16 sps:$4 sm:$0xff]  }
  0x15   :  { %182 = vmatprep.subr.bf16.mxu0 %v1560_v4  ;;  %v1591_v19 = vld [vmem:[#allocation2 + $0x6c] ss:$16 sps:$4 sm:$0xff]   ;;  %v1593_v20 = vld [vmem:[#allocation2 + $0x68] ss:$16 sps:$4 sm:$0xff]   ;;  %v1570_v49 = vld [vmem:[#allocation2 + $0xc0] ss:$16 sps:$4 sm:$0xff]  }
  0x16   :  { %v1597_v21 = vld [vmem:[#allocation2 + $0x4c] ss:$16 sps:$4 sm:$0xff]   ;;  %v1599_v22 = vld [vmem:[#allocation2 + $0x48] ss:$16 sps:$4 sm:$0xff]   ;;  %v1578_v50 = vld [vmem:[#allocation2 + $0xa4] ss:$16 sps:$4 sm:$0xff]  }
  0x17   :  { %1546 = vmatmul.mubr.msk.bf16.vlgmr.msra.gmra.mxu0 %vm85_vm1, %v61_v6  ;;  %665 = vmatpush1.bf16.msra.mxu1 %v1575_v14  ;;  %v1603_v23 = vld [vmem:[#allocation2 + $0x2c] ss:$16 sps:$4 sm:$0xff]   ;;  %v1605_v24 = vld [vmem:[#allocation2 + $0x28] ss:$16 sps:$4 sm:$0xff]   ;;  %v1576_v51 = vld [vmem:[#allocation2 + $0xa0] ss:$16 sps:$4 sm:$0xff]  }
  0x18   :  { %183 = vmatpush1.bf16.msra.mxu0 %v1558_v5  ;;  %202 = vmatprep.mubr.bf16.mxu0 %v1763_v9  ;;  %v1609_v25 = vld [vmem:[#allocation2 + $0xc] ss:$16 sps:$4 sm:$0xff]   ;;  %v1611_v26 = vld [vmem:[#allocation2 + $0x8] ss:$16 sps:$4 sm:$0xff]   ;;  %v1584_v52 = vld [vmem:[#allocation2 + $0x84] ss:$16 sps:$4 sm:$0xff]  }
  0x19   :  { %184 = vmatprep.subr.bf16.mxu0 %v1563_v7  ;;  %666 = vmatprep.subr.bf16.mxu1 %v1579_v15  ;;  %v1615_v27 = vld [vmem:[#allocation2 + $0x1ec] ss:$16 sps:$4 sm:$0xff]   ;;  %v1617_v28 = vld [vmem:[#allocation2 + $0x1e8] ss:$16 sps:$4 sm:$0xff]   ;;  %v1582_v53 = vld [vmem:[#allocation2 + $0x80] ss:$16 sps:$4 sm:$0xff]  }
  0x1a   :  { %v1621_v29 = vld [vmem:[#allocation2 + $0x1cc] ss:$16 sps:$4 sm:$0xff]   ;;  %v1623_v30 = vld [vmem:[#allocation2 + $0x1c8] ss:$16 sps:$4 sm:$0xff]   ;;  %v1590_v54 = vld [vmem:[#allocation2 + $0x64] ss:$16 sps:$4 sm:$0xff]  }
  0x1b   :  { %667 = vmatpush1.bf16.msra.mxu1 %v1581_v16  ;;  %v1627_v31 = vld [vmem:[#allocation2 + $0x1ac] ss:$16 sps:$4 sm:$0xff]   ;;  %v1629_v32 = vld [vmem:[#allocation2 + $0x1a8] ss:$16 sps:$4 sm:$0xff]   ;;  %v1588_v55 = vld [vmem:[#allocation2 + $0x60] ss:$16 sps:$4 sm:$0xff]  }
  0x1c   :  { %185 = vmatpush1.bf16.msra.mxu0 %v1561_v8  ;;  %668 = vmatprep.subr.bf16.mxu1 %v1585_v17  ;;  %v1633_v33 = vld [vmem:[#allocation2 + $0x18c] ss:$16 sps:$4 sm:$0xff]   ;;  %v1635_v34 = vld [vmem:[#allocation2 + $0x188] ss:$16 sps:$4 sm:$0xff]   ;;  %v1596_v56 = vld [vmem:[#allocation2 + $0x44] ss:$16 sps:$4 sm:$0xff]  }
  0x1d   :  { %621 = vmatprep.subr.bf16.mxu0 %v1566_v10  ;;  %v1639_v35 = vld [vmem:[#allocation2 + $0x16c] ss:$16 sps:$4 sm:$0xff]   ;;  %v1641_v36 = vld [vmem:[#allocation2 + $0x168] ss:$16 sps:$4 sm:$0xff]   ;;  %v1594_v57 = vld [vmem:[#allocation2 + $0x40] ss:$16 sps:$4 sm:$0xff]  }
  0x1e   :  { %v1645_v37 = vld [vmem:[#allocation2 + $0x14c] ss:$16 sps:$4 sm:$0xff]   ;;  %v1647_v38 = vld [vmem:[#allocation2 + $0x148] ss:$16 sps:$4 sm:$0xff]   ;;  %v1602_v58 = vld [vmem:[#allocation2 + $0x24] ss:$16 sps:$4 sm:$0xff]  }
  0x1f   :  { %669 = vmatpush1.bf16.msra.mxu1 %v1587_v18  ;;  %v1600_v59 = vld [vmem:[#allocation2 + $0x20] ss:$16 sps:$4 sm:$0xff]   ;;  %v1608_v60 = vld [vmem:[#allocation2 + $0x4] ss:$16 sps:$4 sm:$0xff]   ;;  %v1651_v13 = vld [vmem:[#allocation2 + $0x12c] ss:$16 sps:$4 sm:$0xff]  }
  0x20   :  { %670 = vmatprep.subr.bf16.mxu1 %v1591_v19  ;;  %v1606_v61 = vld [vmem:[#allocation2] ss:$16 sps:$4 sm:$0xff]   ;;  %v1614_v62 = vld [vmem:[#allocation2 + $0x1e4] ss:$16 sps:$4 sm:$0xff]   ;;  %v1653_v15 = vld [vmem:[#allocation2 + $0x128] ss:$16 sps:$4 sm:$0xff]  }
  0x21   :  { %v1612_v63 = vld [vmem:[#allocation2 + $0x1e0] ss:$16 sps:$4 sm:$0xff]   ;;  %v1620_v1 = vld [vmem:[#allocation2 + $0x1c4] ss:$16 sps:$4 sm:$0xff]   ;;  %v1657_v17 = vld [vmem:[#allocation2 + $0x10c] ss:$16 sps:$4 sm:$0xff]  }
  0x22   :  { %v1618_v2 = vld [vmem:[#allocation2 + $0x1c0] ss:$16 sps:$4 sm:$0xff]   ;;  %v1626_v3 = vld [vmem:[#allocation2 + $0x1a4] ss:$16 sps:$4 sm:$0xff]   ;;  %v1659_v19 = vld [vmem:[#allocation2 + $0x108] ss:$16 sps:$4 sm:$0xff]  }
  0x23   :  { %671 = vmatpush1.bf16.msra.mxu1 %v1593_v20  ;;  %v1624_v4 = vld [vmem:[#allocation2 + $0x1a0] ss:$16 sps:$4 sm:$0xff]   ;;  %v1632_v5 = vld [vmem:[#allocation2 + $0x184] ss:$16 sps:$4 sm:$0xff]   ;;  %v1660_v20 = vld [vmem:[%s2070_s7 + $0x78] sm:$0xff]  }
  0x24   :  { %672 = vmatprep.subr.bf16.mxu1 %v1597_v21  ;;  %v1630_v6 = vld [vmem:[#allocation2 + $0x180] ss:$16 sps:$4 sm:$0xff]   ;;  %v1638_v7 = vld [vmem:[#allocation2 + $0x164] ss:$16 sps:$4 sm:$0xff]   ;;  %v1661_v21 = vld [vmem:[%s2070_s7 + $0xf8] sm:$0xff]  }
  0x25   :  { %v1636_v8 = vld [vmem:[#allocation2 + $0x160] ss:$16 sps:$4 sm:$0xff]   ;;  %v1644_v10 = vld [vmem:[#allocation2 + $0x144] ss:$16 sps:$4 sm:$0xff]  }
  0x26   :  { %v1642_v11 = vld [vmem:[#allocation2 + $0x140] ss:$16 sps:$4 sm:$0xff]   ;;  %v1650_v12 = vld [vmem:[#allocation2 + $0x124] ss:$16 sps:$4 sm:$0xff]  }
  0x27   :  { %673 = vmatpush1.bf16.msra.mxu1 %v1599_v22  ;;  %v1648_v14 = vld [vmem:[#allocation2 + $0x120] ss:$16 sps:$4 sm:$0xff]   ;;  %v1656_v16 = vld [vmem:[#allocation2 + $0x104] ss:$16 sps:$4 sm:$0xff]   ;;  %v137_v22 = vlaneseq }
  0x28   :  { %674 = vmatprep.subr.bf16.mxu1 %v1603_v23  ;;  %v1654_v18 = vld [vmem:[#allocation2 + $0x100] ss:$16 sps:$4 sm:$0xff]  }
  0x29   :  { %v1874_v23 = vshrl.u32 %v137_v22, 7 }
  0x2b   :  { %675 = vmatpush1.bf16.msra.mxu1 %v1605_v24  ;;  %v1877_v24 = vsub.s32 0, %v1874_v23 }
  0x2c   :  { %676 = vmatprep.subr.bf16.mxu1 %v1609_v25  ;;  %v135_v25 = vld [vmem:[%s2067_s4] sm:$0x3] }
  0x2f   :  { %677 = vmatpush1.bf16.msra.mxu1 %v1611_v26  ;;  %v1883_v26 = vsub.s32 1, %v1874_v23 }
  0x30   :  { %678 = vmatprep.subr.bf16.mxu1 %v1615_v27  ;;  %v140_v27 = vrot.slane %v135_v25, %v1877_v24 }
  0x33   :  { %679 = vmatpush2.bf16.msra.mxu1 %v1617_v28  ;;  %v144_v28 = vrot.slane %v135_v25, %v1883_v26 }
  0x34   :  { %680 = vmatprep.subr.bf16.mxu1 %v1621_v29 }
  0x37   :  { %681 = vmatpush2.bf16.msra.mxu1 %v1623_v30 }
  0x38   :  { %682 = vmatprep.subr.bf16.mxu1 %v1627_v31 }
  0x3b   :  { %683 = vmatpush2.bf16.msra.mxu1 %v1629_v32 }
  0x3c   :  { %684 = vmatprep.subr.bf16.mxu1 %v1633_v33 }
  0x3f   :  { %685 = vmatpush2.bf16.msra.mxu1 %v1635_v34 }
  0x40   :  { %686 = vmatprep.subr.bf16.mxu1 %v1639_v35 }
  0x43   :  { %687 = vmatpush2.bf16.msra.mxu1 %v1641_v36 }
  0x44   :  { %688 = vmatprep.subr.bf16.mxu1 %v1645_v37 }
  0x47   :  { %689 = vmatpush2.bf16.msra.mxu1 %v1647_v38  ;;  %v1662_v38 = vld [vmem:[%s2070_s7 + $0x38] sm:$0xff]  }
  0x48   :  { %690 = vmatprep.subr.bf16.mxu1 %v1651_v13 }
  0x4b   :  { %691 = vmatpush2.bf16.msra.mxu1 %v1653_v15 }
  0x4c   :  { %692 = vmatprep.subr.bf16.mxu1 %v1657_v17 }
  0x4f   :  { %693 = vmatpush2.bf16.msra.mxu1 %v1659_v19 }
  0x50   :  { %1497 = vmatprep.subr.bf16.mxu1 %v1661_v21 }
  0xd7   :  { %v123_v40 = vpop.f32.mrf.mxu0 }
  0xd8   :  { %v124_v41 = vadd.f32 %v1344_v39, %v123_v40  ;;  %v1663_v39 = vld [vmem:[%s2070_s7 + $0xb8] sm:$0xff]  }
  0xd9   :  { %v1547_v42 = vpop.f32.mrf.mxu0 }
  0xda   :  { %v129_v43 = vmax.f32 %v124_v41, 0.0  ;;  %v1664_v41 = vld [vmem:[%s2070_s7 + $0x70] sm:$0xff]  }
  0xdb   :  { %v126_v44 = vpop.f32.mrf.mxu0  ;;  %v1665_v42 = vld [vmem:[%s2070_s7 + $0xf0] sm:$0xff]  }
  0xdc   :  { %v130_v46 = vpack.c.bf16 %v129_v43, %v129_v43  ;;  %v1666_v43 = vld [vmem:[%s2070_s7 + $0x30] sm:$0xff]  }
  0xdd   :  { %v1548_v48 = vpop.f32.mrf.mxu0  ;;  %v1667_v44 = vld [vmem:[%s2070_s7 + $0xb0] sm:$0xff]  }
  0xde   :  { %1352 = vmatmul.mubr.msk.bf16.vlgmr.msra.gmra.mxu0 %vm85_vm1, %v130_v46  ;;  %v1669_v46 = vld [vmem:[%s2070_s7 + $0xe8] sm:$0xff]  }
  0xdf   :  { %622 = vmatpush1.bf16.msra.mxu0 %v1564_v45  ;;  %v1668_v45 = vld [vmem:[%s2070_s7 + $0x68] sm:$0xff]  }
  0xe0   :  { %623 = vmatprep.subr.bf16.mxu0 %v1572_v47  ;;  %v1670_v47 = vld [vmem:[%s2070_s7 + $0x28] sm:$0xff]  }
  0xe1   :  { %v1671_v48 = vld [vmem:[%s2070_s7 + $0xa8] sm:$0xff]  }
  0xe3   :  { %624 = vmatpush1.bf16.msra.mxu0 %v1570_v49  ;;  %v1672_v49 = vld [vmem:[%s2070_s7 + $0x60] sm:$0xff]  }
  0xe4   :  { %625 = vmatprep.subr.bf16.mxu0 %v1578_v50  ;;  %v1673_v50 = vld [vmem:[%s2070_s7 + $0xe0] sm:$0xff]  }
  0xe7   :  { %626 = vmatpush1.bf16.msra.mxu0 %v1576_v51  ;;  %v1674_v51 = vld [vmem:[%s2070_s7 + $0x20] sm:$0xff]  }
  0xe8   :  { %627 = vmatprep.subr.bf16.mxu0 %v1584_v52  ;;  %v1675_v52 = vld [vmem:[%s2070_s7 + $0xa0] sm:$0xff]  }
  0xeb   :  { %628 = vmatpush1.bf16.msra.mxu0 %v1582_v53  ;;  %v1676_v53 = vld [vmem:[%s2070_s7 + $0x58] sm:$0xff]  }
  0xec   :  { %629 = vmatprep.subr.bf16.mxu0 %v1590_v54  ;;  %v1677_v54 = vld [vmem:[%s2070_s7 + $0xd8] sm:$0xff]  }
  0xef   :  { %630 = vmatpush1.bf16.msra.mxu0 %v1588_v55  ;;  %v1678_v55 = vld [vmem:[%s2070_s7 + $0x18] sm:$0xff]  }
  0xf0   :  { %631 = vmatprep.subr.bf16.mxu0 %v1596_v56  ;;  %v1679_v56 = vld [vmem:[%s2070_s7 + $0x98] sm:$0xff]  }
  0xf3   :  { %632 = vmatpush1.bf16.msra.mxu0 %v1594_v57  ;;  %v1680_v57 = vld [vmem:[%s2070_s7 + $0x50] sm:$0xff]  }
  0xf4   :  { %633 = vmatprep.subr.bf16.mxu0 %v1602_v58  ;;  %v1681_v58 = vld [vmem:[%s2070_s7 + $0xd0] sm:$0xff]  }
  0xf7   :  { %634 = vmatpush1.bf16.msra.mxu0 %v1600_v59  ;;  %v1682_v59 = vld [vmem:[%s2070_s7 + $0x10] sm:$0xff]  }
  0xf8   :  { %635 = vmatprep.subr.bf16.mxu0 %v1608_v60  ;;  %v1683_v60 = vld [vmem:[%s2070_s7 + $0x90] sm:$0xff]  }
  0xfb   :  { %636 = vmatpush1.bf16.msra.mxu0 %v1606_v61  ;;  %v1684_v61 = vld [vmem:[%s2070_s7 + $0x48] sm:$0xff]  }
  0xfc   :  { %637 = vmatprep.subr.bf16.mxu0 %v1614_v62  ;;  %v1685_v62 = vld [vmem:[%s2070_s7 + $0xc8] sm:$0xff]  }
  0xff   :  { %638 = vmatpush2.bf16.msra.mxu0 %v1612_v63  ;;  %v1686_v63 = vld [vmem:[%s2070_s7 + $0x8] sm:$0xff]  }
 0x100   :  { %639 = vmatprep.subr.bf16.mxu0 %v1620_v1  ;;  %v1687_v1 = vld [vmem:[%s2070_s7 + $0x88] sm:$0xff]  }
 0x103   :  { %640 = vmatpush2.bf16.msra.mxu0 %v1618_v2  ;;  %v1688_v2 = vld [vmem:[%s2070_s7 + $0x40] sm:$0xff]  }
 0x104   :  { %641 = vmatprep.subr.bf16.mxu0 %v1626_v3  ;;  %v1689_v3 = vld [vmem:[%s2070_s7 + $0xc0] sm:$0xff]  }
 0x107   :  { %642 = vmatpush2.bf16.msra.mxu0 %v1624_v4  ;;  %v1690_v4 = vld [vmem:[%s2070_s7] sm:$0xff]  }
 0x108   :  { %643 = vmatprep.subr.bf16.mxu0 %v1632_v5  ;;  %v1691_v5 = vld [vmem:[%s2070_s7 + $0x80] sm:$0xff]  }
 0x10b   :  { %644 = vmatpush2.bf16.msra.mxu0 %v1630_v6  ;;  %v291_v6 = vsub.s32 2, %v1874_v23 }
 0x10c   :  { %645 = vmatprep.subr.bf16.mxu0 %v1638_v7  ;;  %v279_v7 = vld [vmem:[%s2069_s6] sm:$0xf] }
 0x10f   :  { %646 = vmatpush2.bf16.msra.mxu0 %v1636_v8  ;;  %v295_v8 = vsub.s32 3, %v1874_v23 }
 0x110   :  { %647 = vmatprep.subr.bf16.mxu0 %v1644_v10  ;;  %v284_v10 = vrot.slane %v279_v7, %v1877_v24 }
 0x111   :  { %v296_v13 = vrot.slane %v279_v7, %v295_v8 }
 0x113   :  { %648 = vmatpush2.bf16.msra.mxu0 %v1642_v11  ;;  %v292_v11 = vrot.slane %v279_v7, %v291_v6  ;;  %v1713_v6 = vld [vmem:[%s2074_s11] sm:$0xff]  }
 0x114   :  { %649 = vmatprep.subr.bf16.mxu0 %v1650_v12  ;;  %v288_v12 = vrot.slane %v279_v7, %v1883_v26  ;;  %v1060_v7 = vld [vmem:[%s2073_s10] sm:$0x3]  ;;  %s1764_s10 = smov [#allocation5]  }
 0x115   :  { %v1065_v8 = vrot.slane %v1060_v7, %v1877_v24  ;;  %s1335_s21 = sshll.u32 %s1764_s10, 4  ;;  %s1336_s21 = int_to_ptr.vmem [resolvable:$true] %s1335_s21 }
 0x116   :  { %p1739_p6 = scmp.lt.s32.totalorder %s1336_s21, %s1336_s21 }
 0x117   :  { %650 = vmatpush2.bf16.msra.mxu0 %v1648_v14 }
 0x118   :  { %651 = vmatprep.subr.bf16.mxu0 %v1656_v16 }
 0x11b   :  { %652 = vmatpush2.bf16.msra.mxu0 %v1654_v18 }
 0x11c   :  { %1475 = vmatprep.subr.bf16.mxu0 %v1660_v20 }
 0x19e   :  { %v204_v29 = vpop.f32.mrf.mxu0 }
 0x19f   :  { %v205_v30 = vadd.f32 %v204_v29, %v140_v27 }
 0x1a0   :  { %v206_v31 = vpop.f32.mrf.mxu0 }
 0x1a1   :  { %v207_v32 = vadd.f32 %v206_v31, %v144_v28  ;;  %v211_v33 = vmax.f32 %v205_v30, 0.0 }
 0x1a2   :  { %v208_v34 = vpop.f32.mrf.mxu0 }
 0x1a3   :  { %v212_v35 = vmax.f32 %v207_v32, 0.0  ;;  %v213_v40 = vpack.c.bf16 %v211_v33, %v211_v33 }
 0x1a4   :  { %v209_v36 = vpop.f32.mrf.mxu0 }
 0x1a5   :  { %v214_v37 = vpack.c.bf16 %v212_v35, %v212_v35  ;;  %v1694_v36 = vld [vmem:[%s2072_s9 + $0x14] ss:$8 sps:$4 sm:$0xff]  }
 0x1a7   :  { %653 = vmatprep.mubr.bf16.mxu0 %v214_v37  ;;  %694 = vmatprep.mubr.bf16.mxu1 %v214_v37  ;;  %v1692_v37 = vld [vmem:[%s2072_s9 + $0x10] ss:$8 sps:$4 sm:$0xff]  }
 0x1a8   :  { %654 = vmatmul.mubr.bf16.vlgmr.msra.gmra.mxu0 %v213_v40  ;;  %695 = vmatmul.mubr.bf16.vlgmr.msra.gmra.mxu1 %v213_v40  ;;  %v1699_v40 = vld [vmem:[%s2074_s11 + $0x38] sm:$0xff]  }
 0x1a9   :  { %1476 = vmatpush3.bf16.msra.mxu0 %v1662_v38  ;;  %1498 = vmatpush3.bf16.msra.mxu1 %v1663_v39  ;;  %v1697_v38 = vld [vmem:[%s2072_s9 + $0x4] ss:$8 sps:$4 sm:$0xff]   ;;  %v1695_v39 = vld [vmem:[%s2072_s9] ss:$8 sps:$4 sm:$0xff]  }
 0x1aa   :  { %1477 = vmatprep.subr.bf16.mxu0 %v1664_v41  ;;  %1499 = vmatprep.subr.bf16.mxu1 %v1665_v42  ;;  %v1700_v41 = vld [vmem:[%s2074_s11 + $0x70] sm:$0xff]  }
 0x1ab   :  { %v1701_v42 = vld [vmem:[%s2074_s11 + $0x30] sm:$0xff]  }
 0x1ad   :  { %1478 = vmatpush3.bf16.msra.mxu0 %v1666_v43  ;;  %1500 = vmatpush3.bf16.msra.mxu1 %v1667_v44  ;;  %v1702_v43 = vld [vmem:[%s2074_s11 + $0x68] sm:$0xff]  }
 0x1ae   :  { %1479 = vmatprep.subr.bf16.mxu0 %v1668_v45  ;;  %1501 = vmatprep.subr.bf16.mxu1 %v1669_v46  ;;  %v1703_v44 = vld [vmem:[%s2074_s11 + $0x28] sm:$0xff]   ;;  %v1704_v45 = vld [vmem:[%s2074_s11 + $0x60] sm:$0xff]  }
 0x1af   :  { %v1705_v46 = vld [vmem:[%s2074_s11 + $0x20] sm:$0xff]  }
 0x1b1   :  { %1480 = vmatpush3.bf16.msra.mxu0 %v1670_v47  ;;  %1502 = vmatpush3.bf16.msra.mxu1 %v1671_v48  ;;  %v1706_v47 = vld [vmem:[%s2074_s11 + $0x58] sm:$0xff]  }
 0x1b2   :  { %1481 = vmatprep.subr.bf16.mxu0 %v1672_v49  ;;  %1503 = vmatprep.subr.bf16.mxu1 %v1673_v50  ;;  %v1707_v48 = vld [vmem:[%s2074_s11 + $0x18] sm:$0xff]   ;;  %v1708_v49 = vld [vmem:[%s2074_s11 + $0x50] sm:$0xff]  }
 0x1b3   :  { %v1709_v50 = vld [vmem:[%s2074_s11 + $0x10] sm:$0xff]  }
 0x1b5   :  { %1482 = vmatpush3.bf16.msra.mxu0 %v1674_v51  ;;  %1504 = vmatpush3.bf16.msra.mxu1 %v1675_v52 }
 0x1b6   :  { %1483 = vmatprep.subr.bf16.mxu0 %v1676_v53  ;;  %1505 = vmatprep.subr.bf16.mxu1 %v1677_v54  ;;  %v1417_v53 = vld [vmem:[%s2071_s8] ss:$0 sm:$0xff] }
 0x1b9   :  { %1484 = vmatpush3.bf16.msra.mxu0 %v1678_v55  ;;  %1506 = vmatpush3.bf16.msra.mxu1 %v1679_v56 }
 0x1ba   :  { %1485 = vmatprep.subr.bf16.mxu0 %v1680_v57  ;;  %1507 = vmatprep.subr.bf16.mxu1 %v1681_v58 }
 0x1bd   :  { %1486 = vmatpush3.bf16.msra.mxu0 %v1682_v59  ;;  %1508 = vmatpush3.bf16.msra.mxu1 %v1683_v60 }
 0x1be   :  { %1487 = vmatprep.subr.bf16.mxu0 %v1684_v61  ;;  %1509 = vmatprep.subr.bf16.mxu1 %v1685_v62 }
 0x1c1   :  { %1488 = vmatpush3.bf16.msra.mxu0 %v1686_v63  ;;  %1510 = vmatpush3.bf16.msra.mxu1 %v1687_v1 }
 0x1c2   :  { %1489 = vmatprep.subr.bf16.mxu0 %v1688_v2  ;;  %1511 = vmatprep.subr.bf16.mxu1 %v1689_v3  ;;  %v1710_v3 = vld [vmem:[%s2074_s11 + $0x48] sm:$0xff]  }
 0x1c5   :  { %1490 = vmatpush3.bf16.msra.mxu0 %v1690_v4  ;;  %1512 = vmatpush3.bf16.msra.mxu1 %v1691_v5  ;;  %v1711_v4 = vld [vmem:[%s2074_s11 + $0x8] sm:$0xff]   ;;  %v1712_v5 = vld [vmem:[%s2074_s11 + $0x40] sm:$0xff]  }
 0x1c6   :  { %1107 = vmatprep.subr.bf16.mxu0 %v1694_v36 }
 0x268   :  { %v655_v14 = vpop.f32.mrf.mxu0  ;;  %v696_v15 = vpop.f32.mrf.mxu1 }
 0x269   :  { %v656_v16 = vadd.f32 %v655_v14, %v284_v10  ;;  %v697_v17 = vadd.f32 %v696_v15, %v292_v11  ;;  %v1069_v10 = vrot.slane %v1060_v7, %v1883_v26 }
 0x26a   :  { %v657_v18 = vpop.f32.mrf.mxu0  ;;  %v698_v19 = vpop.f32.mrf.mxu1 }
 0x26b   :  { %v658_v20 = vadd.f32 %v657_v18, %v288_v12  ;;  %v699_v21 = vadd.f32 %v698_v19, %v296_v13  ;;  %v703_v22 = vmax.f32 %v656_v16, 0.0  ;;  %v705_v25 = vmax.f32 %v697_v17, 0.0 }
 0x26c   :  { %v659_v27 = vpop.f32.mrf.mxu0  ;;  %v700_v28 = vpop.f32.mrf.mxu1 }
 0x26d   :  { %v704_v29 = vmax.f32 %v658_v20, 0.0  ;;  %v706_v23 = vmax.f32 %v699_v21, 0.0  ;;  %v707_v34 = vpack.c.bf16 %v703_v22, %v703_v22  ;;  %v709_v35 = vpack.c.bf16 %v705_v25, %v705_v25  ;;  %v1311_v21 = vld [vmem:[%s2075_s12] sm:$0x1]  ;;  %s1734_s12 = scalar_lea.vmem %s1336_s21, 128 }
 0x26e   :  { %v660_v30 = vpop.f32.mrf.mxu0  ;;  %v701_v31 = vpop.f32.mrf.mxu1  ;;  %v1319_v22 = vsub.f32 1.0, %v1311_v21  ;;  %v1316_v28 = vrot.slane %v1311_v21, %v1877_v24  ;;  %p1735_p5 = scmp.ne.s32.totalorder %s1336_s21, %s1734_s12  ;;  %p1740_p7 = scmp.lt.s32.totalorder %s1734_s12, %s1734_s12 }
 0x26f   :  { %v708_v32 = vpack.c.bf16 %v704_v29, %v704_v29  ;;  %v710_v33 = vpack.c.bf16 %v706_v23, %v706_v23 }
 0x270   :  { %v1324_v29 = vrot.slane %v1319_v22, %v1877_v24  ;;  %p1741_p8 = por %p1740_p7, %p1739_p6 }
 0x271   :  { %1006 = vmatprep.mubr.bf16.mxu0 %v708_v32  ;;  %1046 = vmatprep.mubr.bf16.mxu1 %v710_v33 }
 0x272   :  { %1007 = vmatmul.mubr.bf16.vlgmr.msra.gmra.mxu0 %v707_v34  ;;  %1047 = vmatmul.mubr.bf16.vlgmr.msra.gmra.mxu1 %v709_v35  ;;  %p1742_p9 = pnand %p1741_p8, %p1735_p5 }
 0x273   :  { %1127 = vmatprep.mubr.bf16.mxu0 %v1763_v9  ;;  %1108 = vmatpush1.bf16.msra.mxu0 %v1692_v37  ;;  %v1698_v9 = vld [vmem:[%s2074_s11 + $0x78] sm:$0xff]  }
 0x274   :  { %1109 = vmatprep.subr.bf16.mxu0 %v1697_v38  ;;  %1519 = vmatprep.subr.bf16.mxu1 %v1698_v9 }
 0x275   :  { %1520 = vmatpush3.bf16.msra.mxu1 %v1699_v40 }
 0x276   :  { %1521 = vmatprep.subr.bf16.mxu1 %v1700_v41 }
 0x277   :  { %1110 = vmatpush1.bf16.msra.mxu0 %v1695_v39 }
 0x279   :  { %1522 = vmatpush3.bf16.msra.mxu1 %v1701_v42 }
 0x27a   :  { %1523 = vmatprep.subr.bf16.mxu1 %v1702_v43 }
 0x27d   :  { %1524 = vmatpush3.bf16.msra.mxu1 %v1703_v44 }
 0x27e   :  { %1525 = vmatprep.subr.bf16.mxu1 %v1704_v45 }
 0x281   :  { %1526 = vmatpush3.bf16.msra.mxu1 %v1705_v46 }
 0x282   :  { %1527 = vmatprep.subr.bf16.mxu1 %v1706_v47 }
 0x285   :  { %1528 = vmatpush3.bf16.msra.mxu1 %v1707_v48 }
 0x286   :  { %1529 = vmatprep.subr.bf16.mxu1 %v1708_v49 }
 0x289   :  { %1530 = vmatpush3.bf16.msra.mxu1 %v1709_v50 }
 0x28a   :  { %1531 = vmatprep.subr.bf16.mxu1 %v1710_v3 }
 0x28d   :  { %1532 = vmatpush3.bf16.msra.mxu1 %v1711_v4 }
 0x28e   :  { %1533 = vmatprep.subr.bf16.mxu1 %v1712_v5 }
 0x291   :  { %1534 = vmatpush3.bf16.msra.mxu1 %v1713_v6 }
 0x332   :  { %v1491_v51 = vpop.f32.mrf.mxu0  ;;  %v1513_v52 = vpop.f32.mrf.mxu1 }
 0x334   :  { %v1492_v54 = vpop.f32.mrf.mxu0  ;;  %v1514_v55 = vpop.f32.mrf.mxu1 }
 0x335   :  { %v1493_v56 = vadd.f32 %v1492_v54, %v1491_v51  ;;  %v1515_v60 = vadd.f32 %v1514_v55, %v1513_v52 }
 0x336   :  { %v1494_v57 = vpop.f32.mrf.mxu0  ;;  %v1516_v58 = vpop.f32.mrf.mxu1 }
 0x337   :  { %v1009_v59 = vadd.f32 %v1493_v56, %v1417_v53 }
 0x338   :  { %v1495_v61 = vpop.f32.mrf.mxu0  ;;  %v1517_v62 = vpop.f32.mrf.mxu1 }
 0x339   :  { %v1049_v63 = vadd.f32 %v1515_v60, %v1009_v59 }
 0x33b   :  { %v1054_v1 = vmax.f32 %v1049_v63, 0.0 }
 0x33d   :  { %v1055_v2 = vpack.c.bf16 %v1054_v1, %v1054_v1 }
 0x33f   :  { %1454 = vmatmul.mubr.msk.bf16.vlgmr.msra.gmra.mxu0 %vm85_vm1, %v1055_v2 }
 0x3ff   :  { %v1129_v11 = vpop.f32.mrf.mxu0 }
 0x400   :  { %v1130_v12 = vadd.f32 %v1129_v11, %v1065_v8 }
 0x401   :  { %v1131_v13 = vpop.f32.mrf.mxu0 }
 0x402   :  { %v1132_v14 = vadd.f32 %v1131_v13, %v1069_v10  ;;  %v1136_v15 = vmax.f32 %v1130_v12, 0.0 }
 0x403   :  { %v1133_v16 = vpop.f32.mrf.mxu0 }
 0x404   :  { %v1137_v17 = vmax.f32 %v1132_v14, 0.0  ;;  %v1138_v20 = vpack.c.bf16 %v1136_v15, %v1136_v15 }
 0x405   :  { %v1134_v18 = vpop.f32.mrf.mxu0 }
 0x406   :  { %v1139_v19 = vpack.c.bf16 %v1137_v17, %v1137_v17 }
 0x408   :  { %1300 = vmatprep.mubr.bf16.mxu1 %v1139_v19 }
 0x409   :  { %1301 = vmatmul.mubr.bf16.vlgmr.msra.gmra.mxu1 %v1138_v20 }
 0x4c9   :  { %v1535_v25 = vpop.f32.mrf.mxu1 }
 0x4cb   :  { %v1536_v27 = vpop.f32.mrf.mxu1 }
 0x4cc   :  { %v1537_v26 = vadd.f32 %v1536_v27, %v1535_v25 }
 0x4cd   :  { %v1538_v23 = vpop.f32.mrf.mxu1 }
 0x4ce   :  { %vm1308_vm2 = vcmp.gt.f32.partialorder %v1537_v26, -3.3333334e-05  ;;  %v1326_v33 = vmul.f32 %v1537_v26, %v1324_v29 }
 0x4cf   :  { %v1471_v30 = vsel %vm1308_vm2, 1.0, %v1761_v0  ;;  %v1539_v31 = vpop.f32.mrf.mxu1 }
 0x4d0   :  { %v1318_v32 = vmul.f32 %v1471_v30, %v1316_v28 }
 0x4d2   :  { %v1327_v34 = vadd.f32 %v1326_v33, %v1318_v32 }
 0x4d4   :  { %1328 = vst [vmem:[#allocation5] sm:$0xff] %v1327_v34 }
 0x4d5   :  { %1745 = shalt.err (!%p1742_p9)
}
 0x4d6   :  { %1338 = dma.vmem_to_hbm [thread:$0]  %s1336_s21, 128, %s2076_s13, [#allocation4]  }
 0x4d7   :  { %1756 = dma.done.wait [#allocation4], 128  }
 0x4d8   :  { %1757 = vsyncadd [#allocation4], 4294967168 }
 0x4d9   :  { %1342 = vsyncpa [#allocation3], 1 }
 0x4da   :  { %1343 = vsyncpa [#allocation4], 1 }

// kernel: tpu_custom_call.1
= control target key start
LH: loop header
LB: loop body
LE: loop exit
PB: predicated region body
PF: predicated region fallthrough
CT: control target
= control target key end

     0   :  { %18 = vsyncpa [#allocation3], 0  ;;  %s2063_s0 = inlined_call_operand.vmem [shape: f32[8,32], index: 0, kind: input, shape index: {}]   ;;  %s2064_s1 = inlined_call_operand.vmem [shape: bf16[32,32], index: 1, kind: input, shape index: {}]   ;;  %s2065_s2 = inlined_call_operand.vmem [shape: f32[1,32], index: 2, kind: input, shape index: {}]   ;;  %s2066_s3 = inlined_call_operand.vmem [shape: bf16[32,256], index: 3, kind: input, shape index: {}]   ;;  %s2067_s4 = inlined_call_operand.vmem [shape: f32[1,256], index: 4, kind: input, shape index: {}]   ;;  %s2068_s5 = inlined_call_operand.hbm [shape: bf16[256,512], index: 5, kind: input, shape index: {}]   ;;  %s2069_s6 = inlined_call_operand.vmem [shape: f32[1,512], index: 6, kind: input, shape index: {}]   ;;  %s2070_s7 = inlined_call_operand.vmem [shape: bf16[512,32], index: 7, kind: input, shape index: {}]   ;;  %s2071_s8 = inlined_call_operand.vmem [shape: f32[1,32], index: 8, kind: input, shape index: {}]   ;;  %s2072_s9 = inlined_call_operand.vmem [shape: bf16[32,256], index: 9, kind: input, shape index: {}]   ;;  %s2073_s10 = inlined_call_operand.vmem [shape: f32[1,256], index: 10, kind: input, shape index: {}]   ;;  %s2074_s11 = inlined_call_operand.vmem [shape: bf16[256,128], index: 11, kind: input, shape index: {}]   ;;  %s2075_s12 = inlined_call_operand.vmem [shape: f32[1,128], index: 12, kind: input, shape index: {}]   ;;  %s2076_s13 = inlined_call_operand.hbm [shape: f32[8,128], index: 13, kind: output, shape index: {}]  }
   0x1   :  { %19 = vsyncpa [#allocation4], 0  ;;  %s1758_s25 = smov [#allocation2]  }
   0x2   :  { %s35_s26 = sshll.u32 %s1758_s25, 4  ;;  %s36_s26 = int_to_ptr.vmem [resolvable:$true] %s35_s26 }
   0x3   :  { %s1722_s27 = scalar_lea.vmem %s36_s26, 8192  ;;  %p1727_p1 = scmp.lt.s32.totalorder %s36_s26, %s36_s26 }
   0x4   :  { %p1723_p0 = scmp.ne.s32.totalorder %s36_s26, %s1722_s27  ;;  %p1728_p2 = scmp.lt.s32.totalorder %s1722_s27, %s1722_s27 }
   0x6   :  { %p1729_p3 = por %p1728_p2, %p1727_p1 }
   0x8   :  { %p1730_p4 = pnand %p1729_p3, %p1723_p0 }
   0xa   :  { %1733 = shalt.err (!%p1730_p4)
}
   0xb   :  { %s1759_s28 = smov 256   ;;  %s1760_s29 = smov 16  }
   0xc   :  { %41 = dma.hbm_to_vmem [thread:$0]  %s2068_s5, 8192, %s36_s26, [#allocation3], %s1759_s28, %s1759_s28, %s1760_s29  }
   0xd   :  { %1754 = dma.done.wait [#allocation3], 8192  }
   0xe   :  { %1755 = vsyncadd [#allocation3], 4294959104  ;;  %v1761_v0 = vmov 0.0   ;;  %vm1762_vm0 = vmmov 0   ;;  %v1556_v1 = vld [vmem:[%s2064_s1 + $0x8] sm:$0xff]   ;;  %v1557_v2 = vld [vmem:[%s2064_s1] sm:$0xff]  }
   0xf   :  { %1541 = vmatprep.subr.bf16.mxu0 %v1761_v0  ;;  %1545 = vmatprep.mubr.msk.bf16.mxu0 %vm1762_vm0, %v1761_v0  ;;  %v60_v3 = vld [vmem:[%s2063_s0] sm:$0xff]  ;;  %v1560_v4 = vld [vmem:[%s2066_s3 + $0x14] ss:$8 sps:$4 sm:$0xff]   ;;  %v1558_v5 = vld [vmem:[%s2066_s3 + $0x10] ss:$8 sps:$4 sm:$0xff]   ;;  %vm85_vm1 = vcmask 261120  }
  0x10   :  { %1542 = vmatpush3.bf16.msra.mxu0 %v1556_v1  ;;  %v61_v6 = vpack.c.bf16 %v60_v3, %v60_v3  ;;  %v1563_v7 = vld [vmem:[%s2066_s3 + $0x4] ss:$8 sps:$4 sm:$0xff]   ;;  %v1561_v8 = vld [vmem:[%s2066_s3] ss:$8 sps:$4 sm:$0xff]   ;;  %v1763_v9 = vmov 0  }
  0x11   :  { %1543 = vmatprep.subr.bf16.mxu0 %v1761_v0  ;;  %v1566_v10 = vld [vmem:[#allocation2 + $0xe4] ss:$16 sps:$4 sm:$0xff]   ;;  %v1567_v11 = vld [vmem:[#allocation2 + $0xec] ss:$16 sps:$4 sm:$0xff]   ;;  %v1569_v12 = vld [vmem:[#allocation2 + $0xe8] ss:$16 sps:$4 sm:$0xff]  }
  0x12   :  { %662 = vmatprep.subr.bf16.mxu1 %v1567_v11  ;;  %v1573_v13 = vld [vmem:[#allocation2 + $0xcc] ss:$16 sps:$4 sm:$0xff]   ;;  %v1575_v14 = vld [vmem:[#allocation2 + $0xc8] ss:$16 sps:$4 sm:$0xff]   ;;  %v1344_v39 = vld [vmem:[%s2065_s2] ss:$0 sm:$0xff] }
  0x13   :  { %663 = vmatpush1.bf16.msra.mxu1 %v1569_v12  ;;  %v1579_v15 = vld [vmem:[#allocation2 + $0xac] ss:$16 sps:$4 sm:$0xff]   ;;  %v1581_v16 = vld [vmem:[#allocation2 + $0xa8] ss:$16 sps:$4 sm:$0xff]   ;;  %v1564_v45 = vld [vmem:[#allocation2 + $0xe0] ss:$16 sps:$4 sm:$0xff]  }
  0x14   :  { %1544 = vmatpush3.bf16.msra.mxu0 %v1557_v2  ;;  %664 = vmatprep.subr.bf16.mxu1 %v1573_v13  ;;  %v1585_v17 = vld [vmem:[#allocation2 + $0x8c] ss:$16 sps:$4 sm:$0xff]   ;;  %v1587_v18 = vld [vmem:[#allocation2 + $0x88] ss:$16 sps:$4 sm:$0xff]   ;;  %v1572_v47 = vld [vmem:[#allocation2 + $0xc4] ss:$16 sps:$4 sm:$0xff]  }
  0x15   :  { %182 = vmatprep.subr.bf16.mxu0 %v1560_v4  ;;  %v1591_v19 = vld [vmem:[#allocation2 + $0x6c] ss:$16 sps:$4 sm:$0xff]   ;;  %v1593_v20 = vld [vmem:[#allocation2 + $0x68] ss:$16 sps:$4 sm:$0xff]   ;;  %v1570_v49 = vld [vmem:[#allocation2 + $0xc0] ss:$16 sps:$4 sm:$0xff]  }
  0x16   :  { %v1597_v21 = vld [vmem:[#allocation2 + $0x4c] ss:$16 sps:$4 sm:$0xff]   ;;  %v1599_v22 = vld [vmem:[#allocation2 + $0x48] ss:$16 sps:$4 sm:$0xff]   ;;  %v1578_v50 = vld [vmem:[#allocation2 + $0xa4] ss:$16 sps:$4 sm:$0xff]  }
  0x17   :  { %1546 = vmatmul.mubr.msk.bf16.vlgmr.msra.gmra.mxu0 %vm85_vm1, %v61_v6  ;;  %665 = vmatpush1.bf16.msra.mxu1 %v1575_v14  ;;  %v1603_v23 = vld [vmem:[#allocation2 + $0x2c] ss:$16 sps:$4 sm:$0xff]   ;;  %v1605_v24 = vld [vmem:[#allocation2 + $0x28] ss:$16 sps:$4 sm:$0xff]   ;;  %v1576_v51 = vld [vmem:[#allocation2 + $0xa0] ss:$16 sps:$4 sm:$0xff]  }
  0x18   :  { %183 = vmatpush1.bf16.msra.mxu0 %v1558_v5  ;;  %202 = vmatprep.mubr.bf16.mxu0 %v1763_v9  ;;  %v1609_v25 = vld [vmem:[#allocation2 + $0xc] ss:$16 sps:$4 sm:$0xff]   ;;  %v1611_v26 = vld [vmem:[#allocation2 + $0x8] ss:$16 sps:$4 sm:$0xff]   ;;  %v1584_v52 = vld [vmem:[#allocation2 + $0x84] ss:$16 sps:$4 sm:$0xff]  }
  0x19   :  { %184 = vmatprep.subr.bf16.mxu0 %v1563_v7  ;;  %666 = vmatprep.subr.bf16.mxu1 %v1579_v15  ;;  %v1615_v27 = vld [vmem:[#allocation2 + $0x1ec] ss:$16 sps:$4 sm:$0xff]   ;;  %v1617_v28 = vld [vmem:[#allocation2 + $0x1e8] ss:$16 sps:$4 sm:$0xff]   ;;  %v1582_v53 = vld [vmem:[#allocation2 + $0x80] ss:$16 sps:$4 sm:$0xff]  }
  0x1a   :  { %v1621_v29 = vld [vmem:[#allocation2 + $0x1cc] ss:$16 sps:$4 sm:$0xff]   ;;  %v1623_v30 = vld [vmem:[#allocation2 + $0x1c8] ss:$16 sps:$4 sm:$0xff]   ;;  %v1590_v54 = vld [vmem:[#allocation2 + $0x64] ss:$16 sps:$4 sm:$0xff]  }
  0x1b   :  { %667 = vmatpush1.bf16.msra.mxu1 %v1581_v16  ;;  %v1627_v31 = vld [vmem:[#allocation2 + $0x1ac] ss:$16 sps:$4 sm:$0xff]   ;;  %v1629_v32 = vld [vmem:[#allocation2 + $0x1a8] ss:$16 sps:$4 sm:$0xff]   ;;  %v1588_v55 = vld [vmem:[#allocation2 + $0x60] ss:$16 sps:$4 sm:$0xff]  }
  0x1c   :  { %185 = vmatpush1.bf16.msra.mxu0 %v1561_v8  ;;  %668 = vmatprep.subr.bf16.mxu1 %v1585_v17  ;;  %v1633_v33 = vld [vmem:[#allocation2 + $0x18c] ss:$16 sps:$4 sm:$0xff]   ;;  %v1635_v34 = vld [vmem:[#allocation2 + $0x188] ss:$16 sps:$4 sm:$0xff]   ;;  %v1596_v56 = vld [vmem:[#allocation2 + $0x44] ss:$16 sps:$4 sm:$0xff]  }
  0x1d   :  { %621 = vmatprep.subr.bf16.mxu0 %v1566_v10  ;;  %v1639_v35 = vld [vmem:[#allocation2 + $0x16c] ss:$16 sps:$4 sm:$0xff]   ;;  %v1641_v36 = vld [vmem:[#allocation2 + $0x168] ss:$16 sps:$4 sm:$0xff]   ;;  %v1594_v57 = vld [vmem:[#allocation2 + $0x40] ss:$16 sps:$4 sm:$0xff]  }
  0x1e   :  { %v1645_v37 = vld [vmem:[#allocation2 + $0x14c] ss:$16 sps:$4 sm:$0xff]   ;;  %v1647_v38 = vld [vmem:[#allocation2 + $0x148] ss:$16 sps:$4 sm:$0xff]   ;;  %v1602_v58 = vld [vmem:[#allocation2 + $0x24] ss:$16 sps:$4 sm:$0xff]  }
  0x1f   :  { %669 = vmatpush1.bf16.msra.mxu1 %v1587_v18  ;;  %v1600_v59 = vld [vmem:[#allocation2 + $0x20] ss:$16 sps:$4 sm:$0xff]   ;;  %v1608_v60 = vld [vmem:[#allocation2 + $0x4] ss:$16 sps:$4 sm:$0xff]   ;;  %v1651_v13 = vld [vmem:[#allocation2 + $0x12c] ss:$16 sps:$4 sm:$0xff]  }
  0x20   :  { %670 = vmatprep.subr.bf16.mxu1 %v1591_v19  ;;  %v1606_v61 = vld [vmem:[#allocation2] ss:$16 sps:$4 sm:$0xff]   ;;  %v1614_v62 = vld [vmem:[#allocation2 + $0x1e4] ss:$16 sps:$4 sm:$0xff]   ;;  %v1653_v15 = vld [vmem:[#allocation2 + $0x128] ss:$16 sps:$4 sm:$0xff]  }
  0x21   :  { %v1612_v63 = vld [vmem:[#allocation2 + $0x1e0] ss:$16 sps:$4 sm:$0xff]   ;;  %v1620_v1 = vld [vmem:[#allocation2 + $0x1c4] ss:$16 sps:$4 sm:$0xff]   ;;  %v1657_v17 = vld [vmem:[#allocation2 + $0x10c] ss:$16 sps:$4 sm:$0xff]  }
  0x22   :  { %v1618_v2 = vld [vmem:[#allocation2 + $0x1c0] ss:$16 sps:$4 sm:$0xff]   ;;  %v1626_v3 = vld [vmem:[#allocation2 + $0x1a4] ss:$16 sps:$4 sm:$0xff]   ;;  %v1659_v19 = vld [vmem:[#allocation2 + $0x108] ss:$16 sps:$4 sm:$0xff]  }
  0x23   :  { %671 = vmatpush1.bf16.msra.mxu1 %v1593_v20  ;;  %v1624_v4 = vld [vmem:[#allocation2 + $0x1a0] ss:$16 sps:$4 sm:$0xff]   ;;  %v1632_v5 = vld [vmem:[#allocation2 + $0x184] ss:$16 sps:$4 sm:$0xff]   ;;  %v1660_v20 = vld [vmem:[%s2070_s7 + $0x78] sm:$0xff]  }
  0x24   :  { %672 = vmatprep.subr.bf16.mxu1 %v1597_v21  ;;  %v1630_v6 = vld [vmem:[#allocation2 + $0x180] ss:$16 sps:$4 sm:$0xff]   ;;  %v1638_v7 = vld [vmem:[#allocation2 + $0x164] ss:$16 sps:$4 sm:$0xff]   ;;  %v1661_v21 = vld [vmem:[%s2070_s7 + $0xf8] sm:$0xff]  }
  0x25   :  { %v1636_v8 = vld [vmem:[#allocation2 + $0x160] ss:$16 sps:$4 sm:$0xff]   ;;  %v1644_v10 = vld [vmem:[#allocation2 + $0x144] ss:$16 sps:$4 sm:$0xff]  }
  0x26   :  { %v1642_v11 = vld [vmem:[#allocation2 + $0x140] ss:$16 sps:$4 sm:$0xff]   ;;  %v1650_v12 = vld [vmem:[#allocation2 + $0x124] ss:$16 sps:$4 sm:$0xff]  }
  0x27   :  { %673 = vmatpush1.bf16.msra.mxu1 %v1599_v22  ;;  %v1648_v14 = vld [vmem:[#allocation2 + $0x120] ss:$16 sps:$4 sm:$0xff]   ;;  %v1656_v16 = vld [vmem:[#allocation2 + $0x104] ss:$16 sps:$4 sm:$0xff]   ;;  %v137_v22 = vlaneseq }
  0x28   :  { %674 = vmatprep.subr.bf16.mxu1 %v1603_v23  ;;  %v1654_v18 = vld [vmem:[#allocation2 + $0x100] ss:$16 sps:$4 sm:$0xff]  }
  0x29   :  { %v1874_v23 = vshrl.u32 %v137_v22, 7 }
  0x2b   :  { %675 = vmatpush1.bf16.msra.mxu1 %v1605_v24  ;;  %v1877_v24 = vsub.s32 0, %v1874_v23 }
  0x2c   :  { %676 = vmatprep.subr.bf16.mxu1 %v1609_v25  ;;  %v135_v25 = vld [vmem:[%s2067_s4] sm:$0x3] }
  0x2f   :  { %677 = vmatpush1.bf16.msra.mxu1 %v1611_v26  ;;  %v1883_v26 = vsub.s32 1, %v1874_v23 }
  0x30   :  { %678 = vmatprep.subr.bf16.mxu1 %v1615_v27  ;;  %v140_v27 = vrot.slane %v135_v25, %v1877_v24 }
  0x33   :  { %679 = vmatpush2.bf16.msra.mxu1 %v1617_v28  ;;  %v144_v28 = vrot.slane %v135_v25, %v1883_v26 }
  0x34   :  { %680 = vmatprep.subr.bf16.mxu1 %v1621_v29 }
  0x37   :  { %681 = vmatpush2.bf16.msra.mxu1 %v1623_v30 }
  0x38   :  { %682 = vmatprep.subr.bf16.mxu1 %v1627_v31 }
  0x3b   :  { %683 = vmatpush2.bf16.msra.mxu1 %v1629_v32 }
  0x3c   :  { %684 = vmatprep.subr.bf16.mxu1 %v1633_v33 }
  0x3f   :  { %685 = vmatpush2.bf16.msra.mxu1 %v1635_v34 }
  0x40   :  { %686 = vmatprep.subr.bf16.mxu1 %v1639_v35 }
  0x43   :  { %687 = vmatpush2.bf16.msra.mxu1 %v1641_v36 }
  0x44   :  { %688 = vmatprep.subr.bf16.mxu1 %v1645_v37 }
  0x47   :  { %689 = vmatpush2.bf16.msra.mxu1 %v1647_v38  ;;  %v1662_v38 = vld [vmem:[%s2070_s7 + $0x38] sm:$0xff]  }
  0x48   :  { %690 = vmatprep.subr.bf16.mxu1 %v1651_v13 }
  0x4b   :  { %691 = vmatpush2.bf16.msra.mxu1 %v1653_v15 }
  0x4c   :  { %692 = vmatprep.subr.bf16.mxu1 %v1657_v17 }
  0x4f   :  { %693 = vmatpush2.bf16.msra.mxu1 %v1659_v19 }
  0x50   :  { %1497 = vmatprep.subr.bf16.mxu1 %v1661_v21 }
  0xd7   :  { %v123_v40 = vpop.f32.mrf.mxu0 }
  0xd8   :  { %v124_v41 = vadd.f32 %v1344_v39, %v123_v40  ;;  %v1663_v39 = vld [vmem:[%s2070_s7 + $0xb8] sm:$0xff]  }
  0xd9   :  { %v1547_v42 = vpop.f32.mrf.mxu0 }
  0xda   :  { %v129_v43 = vmax.f32 %v124_v41, 0.0  ;;  %v1664_v41 = vld [vmem:[%s2070_s7 + $0x70] sm:$0xff]  }
  0xdb   :  { %v126_v44 = vpop.f32.mrf.mxu0  ;;  %v1665_v42 = vld [vmem:[%s2070_s7 + $0xf0] sm:$0xff]  }
  0xdc   :  { %v130_v46 = vpack.c.bf16 %v129_v43, %v129_v43  ;;  %v1666_v43 = vld [vmem:[%s2070_s7 + $0x30] sm:$0xff]  }
  0xdd   :  { %v1548_v48 = vpop.f32.mrf.mxu0  ;;  %v1667_v44 = vld [vmem:[%s2070_s7 + $0xb0] sm:$0xff]  }
  0xde   :  { %1352 = vmatmul.mubr.msk.bf16.vlgmr.msra.gmra.mxu0 %vm85_vm1, %v130_v46  ;;  %v1669_v46 = vld [vmem:[%s2070_s7 + $0xe8] sm:$0xff]  }
  0xdf   :  { %622 = vmatpush1.bf16.msra.mxu0 %v1564_v45  ;;  %v1668_v45 = vld [vmem:[%s2070_s7 + $0x68] sm:$0xff]  }
  0xe0   :  { %623 = vmatprep.subr.bf16.mxu0 %v1572_v47  ;;  %v1670_v47 = vld [vmem:[%s2070_s7 + $0x28] sm:$0xff]  }
  0xe1   :  { %v1671_v48 = vld [vmem:[%s2070_s7 + $0xa8] sm:$0xff]  }
  0xe3   :  { %624 = vmatpush1.bf16.msra.mxu0 %v1570_v49  ;;  %v1672_v49 = vld [vmem:[%s2070_s7 + $0x60] sm:$0xff]  }
  0xe4   :  { %625 = vmatprep.subr.bf16.mxu0 %v1578_v50  ;;  %v1673_v50 = vld [vmem:[%s2070_s7 + $0xe0] sm:$0xff]  }
  0xe7   :  { %626 = vmatpush1.bf16.msra.mxu0 %v1576_v51  ;;  %v1674_v51 = vld [vmem:[%s2070_s7 + $0x20] sm:$0xff]  }
  0xe8   :  { %627 = vmatprep.subr.bf16.mxu0 %v1584_v52  ;;  %v1675_v52 = vld [vmem:[%s2070_s7 + $0xa0] sm:$0xff]  }
  0xeb   :  { %628 = vmatpush1.bf16.msra.mxu0 %v1582_v53  ;;  %v1676_v53 = vld [vmem:[%s2070_s7 + $0x58] sm:$0xff]  }
  0xec   :  { %629 = vmatprep.subr.bf16.mxu0 %v1590_v54  ;;  %v1677_v54 = vld [vmem:[%s2070_s7 + $0xd8] sm:$0xff]  }
  0xef   :  { %630 = vmatpush1.bf16.msra.mxu0 %v1588_v55  ;;  %v1678_v55 = vld [vmem:[%s2070_s7 + $0x18] sm:$0xff]  }
  0xf0   :  { %631 = vmatprep.subr.bf16.mxu0 %v1596_v56  ;;  %v1679_v56 = vld [vmem:[%s2070_s7 + $0x98] sm:$0xff]  }
  0xf3   :  { %632 = vmatpush1.bf16.msra.mxu0 %v1594_v57  ;;  %v1680_v57 = vld [vmem:[%s2070_s7 + $0x50] sm:$0xff]  }
  0xf4   :  { %633 = vmatprep.subr.bf16.mxu0 %v1602_v58  ;;  %v1681_v58 = vld [vmem:[%s2070_s7 + $0xd0] sm:$0xff]  }
  0xf7   :  { %634 = vmatpush1.bf16.msra.mxu0 %v1600_v59  ;;  %v1682_v59 = vld [vmem:[%s2070_s7 + $0x10] sm:$0xff]  }
  0xf8   :  { %635 = vmatprep.subr.bf16.mxu0 %v1608_v60  ;;  %v1683_v60 = vld [vmem:[%s2070_s7 + $0x90] sm:$0xff]  }
  0xfb   :  { %636 = vmatpush1.bf16.msra.mxu0 %v1606_v61  ;;  %v1684_v61 = vld [vmem:[%s2070_s7 + $0x48] sm:$0xff]  }
  0xfc   :  { %637 = vmatprep.subr.bf16.mxu0 %v1614_v62  ;;  %v1685_v62 = vld [vmem:[%s2070_s7 + $0xc8] sm:$0xff]  }
  0xff   :  { %638 = vmatpush2.bf16.msra.mxu0 %v1612_v63  ;;  %v1686_v63 = vld [vmem:[%s2070_s7 + $0x8] sm:$0xff]  }
 0x100   :  { %639 = vmatprep.subr.bf16.mxu0 %v1620_v1  ;;  %v1687_v1 = vld [vmem:[%s2070_s7 + $0x88] sm:$0xff]  }
 0x103   :  { %640 = vmatpush2.bf16.msra.mxu0 %v1618_v2  ;;  %v1688_v2 = vld [vmem:[%s2070_s7 + $0x40] sm:$0xff]  }
 0x104   :  { %641 = vmatprep.subr.bf16.mxu0 %v1626_v3  ;;  %v1689_v3 = vld [vmem:[%s2070_s7 + $0xc0] sm:$0xff]  }
 0x107   :  { %642 = vmatpush2.bf16.msra.mxu0 %v1624_v4  ;;  %v1690_v4 = vld [vmem:[%s2070_s7] sm:$0xff]  }
 0x108   :  { %643 = vmatprep.subr.bf16.mxu0 %v1632_v5  ;;  %v1691_v5 = vld [vmem:[%s2070_s7 + $0x80] sm:$0xff]  }
 0x10b   :  { %644 = vmatpush2.bf16.msra.mxu0 %v1630_v6  ;;  %v291_v6 = vsub.s32 2, %v1874_v23 }
 0x10c   :  { %645 = vmatprep.subr.bf16.mxu0 %v1638_v7  ;;  %v279_v7 = vld [vmem:[%s2069_s6] sm:$0xf] }
 0x10f   :  { %646 = vmatpush2.bf16.msra.mxu0 %v1636_v8  ;;  %v295_v8 = vsub.s32 3, %v1874_v23 }
 0x110   :  { %647 = vmatprep.subr.bf16.mxu0 %v1644_v10  ;;  %v284_v10 = vrot.slane %v279_v7, %v1877_v24 }
 0x111   :  { %v296_v13 = vrot.slane %v279_v7, %v295_v8 }
 0x113   :  { %648 = vmatpush2.bf16.msra.mxu0 %v1642_v11  ;;  %v292_v11 = vrot.slane %v279_v7, %v291_v6  ;;  %v1713_v6 = vld [vmem:[%s2074_s11] sm:$0xff]  }
 0x114   :  { %649 = vmatprep.subr.bf16.mxu0 %v1650_v12  ;;  %v288_v12 = vrot.slane %v279_v7, %v1883_v26  ;;  %v1060_v7 = vld [vmem:[%s2073_s10] sm:$0x3]  ;;  %s1764_s10 = smov [#allocation5]  }
 0x115   :  { %v1065_v8 = vrot.slane %v1060_v7, %v1877_v24  ;;  %s1335_s21 = sshll.u32 %s1764_s10, 4  ;;  %s1336_s21 = int_to_ptr.vmem [resolvable:$true] %s1335_s21 }
 0x116   :  { %p1739_p6 = scmp.lt.s32.totalorder %s1336_s21, %s1336_s21 }
 0x117   :  { %650 = vmatpush2.bf16.msra.mxu0 %v1648_v14 }
 0x118   :  { %651 = vmatprep.subr.bf16.mxu0 %v1656_v16 }
 0x11b   :  { %652 = vmatpush2.bf16.msra.mxu0 %v1654_v18 }
 0x11c   :  { %1475 = vmatprep.subr.bf16.mxu0 %v1660_v20 }
 0x19e   :  { %v204_v29 = vpop.f32.mrf.mxu0 }
 0x19f   :  { %v205_v30 = vadd.f32 %v204_v29, %v140_v27 }
 0x1a0   :  { %v206_v31 = vpop.f32.mrf.mxu0 }
 0x1a1   :  { %v207_v32 = vadd.f32 %v206_v31, %v144_v28  ;;  %v211_v33 = vmax.f32 %v205_v30, 0.0 }
 0x1a2   :  { %v208_v34 = vpop.f32.mrf.mxu0 }
 0x1a3   :  { %v212_v35 = vmax.f32 %v207_v32, 0.0  ;;  %v213_v40 = vpack.c.bf16 %v211_v33, %v211_v33 }
 0x1a4   :  { %v209_v36 = vpop.f32.mrf.mxu0 }
 0x1a5   :  { %v214_v37 = vpack.c.bf16 %v212_v35, %v212_v35  ;;  %v1694_v36 = vld [vmem:[%s2072_s9 + $0x14] ss:$8 sps:$4 sm:$0xff]  }
 0x1a7   :  { %653 = vmatprep.mubr.bf16.mxu0 %v214_v37  ;;  %694 = vmatprep.mubr.bf16.mxu1 %v214_v37  ;;  %v1692_v37 = vld [vmem:[%s2072_s9 + $0x10] ss:$8 sps:$4 sm:$0xff]  }
 0x1a8   :  { %654 = vmatmul.mubr.bf16.vlgmr.msra.gmra.mxu0 %v213_v40  ;;  %695 = vmatmul.mubr.bf16.vlgmr.msra.gmra.mxu1 %v213_v40  ;;  %v1699_v40 = vld [vmem:[%s2074_s11 + $0x38] sm:$0xff]  }
 0x1a9   :  { %1476 = vmatpush3.bf16.msra.mxu0 %v1662_v38  ;;  %1498 = vmatpush3.bf16.msra.mxu1 %v1663_v39  ;;  %v1697_v38 = vld [vmem:[%s2072_s9 + $0x4] ss:$8 sps:$4 sm:$0xff]   ;;  %v1695_v39 = vld [vmem:[%s2072_s9] ss:$8 sps:$4 sm:$0xff]  }
 0x1aa   :  { %1477 = vmatprep.subr.bf16.mxu0 %v1664_v41  ;;  %1499 = vmatprep.subr.bf16.mxu1 %v1665_v42  ;;  %v1700_v41 = vld [vmem:[%s2074_s11 + $0x70] sm:$0xff]  }
 0x1ab   :  { %v1701_v42 = vld [vmem:[%s2074_s11 + $0x30] sm:$0xff]  }
 0x1ad   :  { %1478 = vmatpush3.bf16.msra.mxu0 %v1666_v43  ;;  %1500 = vmatpush3.bf16.msra.mxu1 %v1667_v44  ;;  %v1702_v43 = vld [vmem:[%s2074_s11 + $0x68] sm:$0xff]  }
 0x1ae   :  { %1479 = vmatprep.subr.bf16.mxu0 %v1668_v45  ;;  %1501 = vmatprep.subr.bf16.mxu1 %v1669_v46  ;;  %v1703_v44 = vld [vmem:[%s2074_s11 + $0x28] sm:$0xff]   ;;  %v1704_v45 = vld [vmem:[%s2074_s11 + $0x60] sm:$0xff]  }
 0x1af   :  { %v1705_v46 = vld [vmem:[%s2074_s11 + $0x20] sm:$0xff]  }
 0x1b1   :  { %1480 = vmatpush3.bf16.msra.mxu0 %v1670_v47  ;;  %1502 = vmatpush3.bf16.msra.mxu1 %v1671_v48  ;;  %v1706_v47 = vld [vmem:[%s2074_s11 + $0x58] sm:$0xff]  }
 0x1b2   :  { %1481 = vmatprep.subr.bf16.mxu0 %v1672_v49  ;;  %1503 = vmatprep.subr.bf16.mxu1 %v1673_v50  ;;  %v1707_v48 = vld [vmem:[%s2074_s11 + $0x18] sm:$0xff]   ;;  %v1708_v49 = vld [vmem:[%s2074_s11 + $0x50] sm:$0xff]  }
 0x1b3   :  { %v1709_v50 = vld [vmem:[%s2074_s11 + $0x10] sm:$0xff]  }
 0x1b5   :  { %1482 = vmatpush3.bf16.msra.mxu0 %v1674_v51  ;;  %1504 = vmatpush3.bf16.msra.mxu1 %v1675_v52 }
 0x1b6   :  { %1483 = vmatprep.subr.bf16.mxu0 %v1676_v53  ;;  %1505 = vmatprep.subr.bf16.mxu1 %v1677_v54  ;;  %v1417_v53 = vld [vmem:[%s2071_s8] ss:$0 sm:$0xff] }
 0x1b9   :  { %1484 = vmatpush3.bf16.msra.mxu0 %v1678_v55  ;;  %1506 = vmatpush3.bf16.msra.mxu1 %v1679_v56 }
 0x1ba   :  { %1485 = vmatprep.subr.bf16.mxu0 %v1680_v57  ;;  %1507 = vmatprep.subr.bf16.mxu1 %v1681_v58 }
 0x1bd   :  { %1486 = vmatpush3.bf16.msra.mxu0 %v1682_v59  ;;  %1508 = vmatpush3.bf16.msra.mxu1 %v1683_v60 }
 0x1be   :  { %1487 = vmatprep.subr.bf16.mxu0 %v1684_v61  ;;  %1509 = vmatprep.subr.bf16.mxu1 %v1685_v62 }
 0x1c1   :  { %1488 = vmatpush3.bf16.msra.mxu0 %v1686_v63  ;;  %1510 = vmatpush3.bf16.msra.mxu1 %v1687_v1 }
 0x1c2   :  { %1489 = vmatprep.subr.bf16.mxu0 %v1688_v2  ;;  %1511 = vmatprep.subr.bf16.mxu1 %v1689_v3  ;;  %v1710_v3 = vld [vmem:[%s2074_s11 + $0x48] sm:$0xff]  }
 0x1c5   :  { %1490 = vmatpush3.bf16.msra.mxu0 %v1690_v4  ;;  %1512 = vmatpush3.bf16.msra.mxu1 %v1691_v5  ;;  %v1711_v4 = vld [vmem:[%s2074_s11 + $0x8] sm:$0xff]   ;;  %v1712_v5 = vld [vmem:[%s2074_s11 + $0x40] sm:$0xff]  }
 0x1c6   :  { %1107 = vmatprep.subr.bf16.mxu0 %v1694_v36 }
 0x268   :  { %v655_v14 = vpop.f32.mrf.mxu0  ;;  %v696_v15 = vpop.f32.mrf.mxu1 }
 0x269   :  { %v656_v16 = vadd.f32 %v655_v14, %v284_v10  ;;  %v697_v17 = vadd.f32 %v696_v15, %v292_v11  ;;  %v1069_v10 = vrot.slane %v1060_v7, %v1883_v26 }
 0x26a   :  { %v657_v18 = vpop.f32.mrf.mxu0  ;;  %v698_v19 = vpop.f32.mrf.mxu1 }
 0x26b   :  { %v658_v20 = vadd.f32 %v657_v18, %v288_v12  ;;  %v699_v21 = vadd.f32 %v698_v19, %v296_v13  ;;  %v703_v22 = vmax.f32 %v656_v16, 0.0  ;;  %v705_v25 = vmax.f32 %v697_v17, 0.0 }
 0x26c   :  { %v659_v27 = vpop.f32.mrf.mxu0  ;;  %v700_v28 = vpop.f32.mrf.mxu1 }
 0x26d   :  { %v704_v29 = vmax.f32 %v658_v20, 0.0  ;;  %v706_v23 = vmax.f32 %v699_v21, 0.0  ;;  %v707_v34 = vpack.c.bf16 %v703_v22, %v703_v22  ;;  %v709_v35 = vpack.c.bf16 %v705_v25, %v705_v25  ;;  %v1311_v21 = vld [vmem:[%s2075_s12] sm:$0x1]  ;;  %s1734_s12 = scalar_lea.vmem %s1336_s21, 128 }
 0x26e   :  { %v660_v30 = vpop.f32.mrf.mxu0  ;;  %v701_v31 = vpop.f32.mrf.mxu1  ;;  %v1319_v22 = vsub.f32 1.0, %v1311_v21  ;;  %v1316_v28 = vrot.slane %v1311_v21, %v1877_v24  ;;  %p1735_p5 = scmp.ne.s32.totalorder %s1336_s21, %s1734_s12  ;;  %p1740_p7 = scmp.lt.s32.totalorder %s1734_s12, %s1734_s12 }
 0x26f   :  { %v708_v32 = vpack.c.bf16 %v704_v29, %v704_v29  ;;  %v710_v33 = vpack.c.bf16 %v706_v23, %v706_v23 }
 0x270   :  { %v1324_v29 = vrot.slane %v1319_v22, %v1877_v24  ;;  %p1741_p8 = por %p1740_p7, %p1739_p6 }
 0x271   :  { %1006 = vmatprep.mubr.bf16.mxu0 %v708_v32  ;;  %1046 = vmatprep.mubr.bf16.mxu1 %v710_v33 }
 0x272   :  { %1007 = vmatmul.mubr.bf16.vlgmr.msra.gmra.mxu0 %v707_v34  ;;  %1047 = vmatmul.mubr.bf16.vlgmr.msra.gmra.mxu1 %v709_v35  ;;  %p1742_p9 = pnand %p1741_p8, %p1735_p5 }
 0x273   :  { %1127 = vmatprep.mubr.bf16.mxu0 %v1763_v9  ;;  %1108 = vmatpush1.bf16.msra.mxu0 %v1692_v37  ;;  %v1698_v9 = vld [vmem:[%s2074_s11 + $0x78] sm:$0xff]  }
 0x274   :  { %1109 = vmatprep.subr.bf16.mxu0 %v1697_v38  ;;  %1519 = vmatprep.subr.bf16.mxu1 %v1698_v9 }
 0x275   :  { %1520 = vmatpush3.bf16.msra.mxu1 %v1699_v40 }
 0x276   :  { %1521 = vmatprep.subr.bf16.mxu1 %v1700_v41 }
 0x277   :  { %1110 = vmatpush1.bf16.msra.mxu0 %v1695_v39 }
 0x279   :  { %1522 = vmatpush3.bf16.msra.mxu1 %v1701_v42 }
 0x27a   :  { %1523 = vmatprep.subr.bf16.mxu1 %v1702_v43 }
 0x27d   :  { %1524 = vmatpush3.bf16.msra.mxu1 %v1703_v44 }
 0x27e   :  { %1525 = vmatprep.subr.bf16.mxu1 %v1704_v45 }
 0x281   :  { %1526 = vmatpush3.bf16.msra.mxu1 %v1705_v46 }
 0x282   :  { %1527 = vmatprep.subr.bf16.mxu1 %v1706_v47 }
 0x285   :  { %1528 = vmatpush3.bf16.msra.mxu1 %v1707_v48 }
 0x286   :  { %1529 = vmatprep.subr.bf16.mxu1 %v1708_v49 }
 0x289   :  { %1530 = vmatpush3.bf16.msra.mxu1 %v1709_v50 }
 0x28a   :  { %1531 = vmatprep.subr.bf16.mxu1 %v1710_v3 }
 0x28d   :  { %1532 = vmatpush3.bf16.msra.mxu1 %v1711_v4 }
 0x28e   :  { %1533 = vmatprep.subr.bf16.mxu1 %v1712_v5 }
 0x291   :  { %1534 = vmatpush3.bf16.msra.mxu1 %v1713_v6 }
 0x332   :  { %v1491_v51 = vpop.f32.mrf.mxu0  ;;  %v1513_v52 = vpop.f32.mrf.mxu1 }
 0x334   :  { %v1492_v54 = vpop.f32.mrf.mxu0  ;;  %v1514_v55 = vpop.f32.mrf.mxu1 }
 0x335   :  { %v1493_v56 = vadd.f32 %v1492_v54, %v1491_v51  ;;  %v1515_v60 = vadd.f32 %v1514_v55, %v1513_v52 }
 0x336   :  { %v1494_v57 = vpop.f32.mrf.mxu0  ;;  %v1516_v58 = vpop.f32.mrf.mxu1 }
 0x337   :  { %v1009_v59 = vadd.f32 %v1493_v56, %v1417_v53 }
 0x338   :  { %v1495_v61 = vpop.f32.mrf.mxu0  ;;  %v1517_v62 = vpop.f32.mrf.mxu1 }
 0x339   :  { %v1049_v63 = vadd.f32 %v1515_v60, %v1009_v59 }
 0x33b   :  { %v1054_v1 = vmax.f32 %v1049_v63, 0.0 }
 0x33d   :  { %v1055_v2 = vpack.c.bf16 %v1054_v1, %v1054_v1 }
 0x33f   :  { %1454 = vmatmul.mubr.msk.bf16.vlgmr.msra.gmra.mxu0 %vm85_vm1, %v1055_v2 }
 0x3ff   :  { %v1129_v11 = vpop.f32.mrf.mxu0 }
 0x400   :  { %v1130_v12 = vadd.f32 %v1129_v11, %v1065_v8 }
 0x401   :  { %v1131_v13 = vpop.f32.mrf.mxu0 }
 0x402   :  { %v1132_v14 = vadd.f32 %v1131_v13, %v1069_v10  ;;  %v1136_v15 = vmax.f32 %v1130_v12, 0.0 }
 0x403   :  { %v1133_v16 = vpop.f32.mrf.mxu0 }
 0x404   :  { %v1137_v17 = vmax.f32 %v1132_v14, 0.0  ;;  %v1138_v20 = vpack.c.bf16 %v1136_v15, %v1136_v15 }
 0x405   :  { %v1134_v18 = vpop.f32.mrf.mxu0 }
 0x406   :  { %v1139_v19 = vpack.c.bf16 %v1137_v17, %v1137_v17 }
 0x408   :  { %1300 = vmatprep.mubr.bf16.mxu1 %v1139_v19 }
 0x409   :  { %1301 = vmatmul.mubr.bf16.vlgmr.msra.gmra.mxu1 %v1138_v20 }
 0x4c9   :  { %v1535_v25 = vpop.f32.mrf.mxu1 }
 0x4cb   :  { %v1536_v27 = vpop.f32.mrf.mxu1 }
 0x4cc   :  { %v1537_v26 = vadd.f32 %v1536_v27, %v1535_v25 }
 0x4cd   :  { %v1538_v23 = vpop.f32.mrf.mxu1 }
 0x4ce   :  { %vm1308_vm2 = vcmp.gt.f32.partialorder %v1537_v26, -3.3333334e-05  ;;  %v1326_v33 = vmul.f32 %v1537_v26, %v1324_v29 }
 0x4cf   :  { %v1471_v30 = vsel %vm1308_vm2, 1.0, %v1761_v0  ;;  %v1539_v31 = vpop.f32.mrf.mxu1 }
 0x4d0   :  { %v1318_v32 = vmul.f32 %v1471_v30, %v1316_v28 }
 0x4d2   :  { %v1327_v34 = vadd.f32 %v1326_v33, %v1318_v32 }
 0x4d4   :  { %1328 = vst [vmem:[#allocation5] sm:$0xff] %v1327_v34 }
 0x4d5   :  { %1745 = shalt.err (!%p1742_p9)
}
 0x4d6   :  { %1338 = dma.vmem_to_hbm [thread:$0]  %s1336_s21, 128, %s2076_s13, [#allocation4]  }
 0x4d7   :  { %1756 = dma.done.wait [#allocation4], 128  }
 0x4d8   :  { %1757 = vsyncadd [#allocation4], 4294967168 }
 0x4d9   :  { %1342 = vsyncpa [#allocation3], 1 }
 0x4da   :  { %1343 = vsyncpa [#allocation4], 1 }

</bundles_post_ra>
